<compile_context>
chip_gen: v7x
topology: tpu7x:2x2x1
jax: 0.10.0
libtpu: 0.0.40
codegen_flags: <defaults>
</compile_context>

<pallas_src>
import functools

import jax
import jax.numpy as jnp
from jax.experimental import pallas as pl
from jax.experimental.pallas import tpu as pltpu


# ----------------------------------------------------------------------------
# Helpers
# ----------------------------------------------------------------------------
def _full_block_specs(items):
    """Full-array blocks for a grid=(1,) pallas_call (block == array => tiling-rule exempt)."""
    return [pl.BlockSpec(tuple(it.shape), lambda i, nd=len(it.shape): (0,) * nd)
            for it in items]


def _dot(a, b):
    return jnp.dot(a, b, preferred_element_type=jnp.float32)


def _dot_t(a, b):
    # a [M, K] contracted with b [N, K] -> [M, N].  Transpose happens on-chip
    # (XLU), so no host-side relayout op feeds the kernel.
    return jnp.dot(a, b.T, preferred_element_type=jnp.float32)


# ----------------------------------------------------------------------------
# Fused forward kernel: StateEncoder + task decoder + StateDecoder + ActionDecoder
# ----------------------------------------------------------------------------
def _forward_kernel(
        B,
        # ---- inputs ----
        obs_ref, prompts_ref,
        wvis_ref, bvis_ref, wlang_ref, blang_ref,
        avg_before_ref, avg_after_ref, avg_all_ref,
        wt1a_ref, wt1b_ref, bt1_ref, wt2_ref, bt2_ref,
        wtask_ref,
        mix_s_ref, mix_e_ref, mix_t_ref,
        wdec_ref, bdec_ref,
        sel_l_ref, sel_r_ref,
        wacta_ref, wactb_ref, bact_ref,
        # ---- outputs ----
        slog_s_ref, slog_e_ref, task_ref, dec_ref, act_ref, penc_ref):
    bf16 = jnp.bfloat16

    # ---------------- StateEncoder ----------------
    # batched visual projection: [2B, vis] (bf16) @ [vis, E] (bf16) -> f32
    obs_feat = _dot(obs_ref[...], wvis_ref[...]) + bvis_ref[...]            # [2B, E]
    start_feat = obs_feat[:B, :]                                            # [B, E]
    end_feat = obs_feat[B:, :]                                              # [B, E]

    # language prompt projection: [A*P, lang] -> [A*P, E]
    prompts_enc = _dot(prompts_ref[...], wlang_ref[...]) + blang_ref[...]   # [A*P, E]
    penc_ref[...] = prompts_enc

    # prompt means via constant averaging matmuls (no 3-D reshape in-kernel)
    before_mean = _dot(avg_before_ref[...], prompts_enc)                    # [A, E]
    after_mean = _dot(avg_after_ref[...], prompts_enc)                      # [A, E]
    prompt_mean = _dot(avg_all_ref[...], prompts_enc)                       # [A, E]

    # start/end state <-> language similarity logits
    slog_s_ref[...] = _dot_t(start_feat, before_mean)                       # [B, A]
    slog_e_ref[...] = _dot_t(end_feat, after_mean)                          # [B, A]

    # ---------------- task decoder: Linear(2E->E) + ReLU + Dropout(id) + Linear ----
    h = (_dot(start_feat.astype(bf16), wt1a_ref[...])
         + _dot(end_feat.astype(bf16), wt1b_ref[...]) + bt1_ref[...])
    h = jnp.maximum(h, 0.0)
    task_pred = _dot(h.astype(bf16), wt2_ref[...]) + bt2_ref[...]           # [B, num_tasks]
    task_ref[...] = task_pred

    # ---------------- StateDecoder: softmax -> task embed -> interp -> Linear ----
    m = jnp.max(task_pred, axis=-1, keepdims=True)
    e = jnp.exp(task_pred - m)
    task_prob = e / jnp.sum(e, axis=-1, keepdims=True)
    task_embed = _dot(task_prob.astype(bf16), wtask_ref[...])               # [B, E]

    # interp[b*(T+1)+t] = (1-a_t)*start[b] + a_t*end[b] + task_embed[b]
    interp = (_dot(mix_s_ref[...], start_feat)
              + _dot(mix_e_ref[...], end_feat)
              + _dot(mix_t_ref[...], task_embed))                           # [B*(T+1), E]
    decoded = _dot(interp.astype(bf16), wdec_ref[...]) + bdec_ref[...]      # [B*(T+1), E]
    dec_ref[...] = decoded

    # ---------------- ActionDecoder: (state_t, state_{t+1}) -> Linear+ReLU -> prompt sim
    left = _dot(sel_l_ref[...], decoded)                                    # [B*T, E]
    right = _dot(sel_r_ref[...], decoded)                                   # [B*T, E]
    ha = (_dot(left.astype(bf16), wacta_ref[...])
          + _dot(right.astype(bf16), wactb_ref[...]) + bact_ref[...])
    ha = jnp.maximum(ha, 0.0)
    act_ref[...] = _dot_t(ha, prompt_mean)                                  # [B*T, A]


# ----------------------------------------------------------------------------
# Fused loss kernel: 3x mean cross-entropy + 1x MSE, fully reduced in-kernel
# ----------------------------------------------------------------------------
def _loss_kernel(slog_ref, slab_ref, alog_ref, alab_ref, tlog_ref, tlab_ref,
                 sdp_ref, sdt_ref, out_ref):
    def mean_ce(logits, labels):
        # logits [M, C] f32, labels [M, 1] int32  ->  (1, 1) mean NLL
        m = jnp.max(logits, axis=-1, keepdims=True)
        z = logits - m
        lse = jnp.log(jnp.sum(jnp.exp(z), axis=-1, keepdims=True))          # [M, 1]
        cols = jax.lax.broadcasted_iota(jnp.int32, logits.shape, 1)
        tgt = jnp.sum(jnp.where(cols == labels, z, 0.0), axis=-1, keepdims=True)
        nll = lse - tgt                                                      # [M, 1]
        return jnp.sum(nll, axis=0, keepdims=True) / float(logits.shape[0])  # (1, 1)

    l_state = mean_ce(slog_ref[...], slab_ref[...])
    l_action = mean_ce(alog_ref[...], alab_ref[...])
    l_task = mean_ce(tlog_ref[...], tlab_ref[...])

    d = sdp_ref[...] - sdt_ref[...]
    row = jnp.sum(d * d, axis=-1, keepdims=True)                             # [M, 1]
    denom = float(sdp_ref.shape[0] * sdp_ref.shape[1])
    l_mse = jnp.sum(row, axis=0, keepdims=True) / denom                      # (1, 1)

    lane = jax.lax.broadcasted_iota(jnp.int32, (1, 4), 1)
    out_ref[...] = (jnp.where(lane == 0, l_state, 0.0)
                    + jnp.where(lane == 1, l_mse, 0.0)
                    + jnp.where(lane == 2, l_action, 0.0)
                    + jnp.where(lane == 3, l_task, 0.0))


# ----------------------------------------------------------------------------
# pallas_call wrappers
# ----------------------------------------------------------------------------
def _fused_forward(params, consts, obs_bf16, prompts_bf16, dims):
    B, T, A, P, E, NT = dims
    inputs = [
        obs_bf16, prompts_bf16,
        params["W_vis"], params["b_vis"], params["W_lang"], params["b_lang"],
        consts["avg_before"], consts["avg_after"], consts["avg_all"],
        params["W_t1a"], params["W_t1b"], params["b_t1"],
        params["W_t2"], params["b_t2"],
        params["W_task_embed"],
        consts["mix_s"], consts["mix_e"], consts["mix_t"],
        params["W_dec"], params["b_dec"],
        consts["sel_l"], consts["sel_r"],
        params["W_act_a"], params["W_act_b"], params["b_act"],
    ]
    out_shapes = (
        jax.ShapeDtypeStruct((B, A), jnp.float32),              # start-state logits
        jax.ShapeDtypeStruct((B, A), jnp.float32),              # end-state logits
        jax.ShapeDtypeStruct((B, NT), jnp.float32),             # task prediction
        jax.ShapeDtypeStruct((B * (T + 1), E), jnp.float32),    # decoded state features (flat)
        jax.ShapeDtypeStruct((B * T, A), jnp.float32),          # action logits (flat)
        jax.ShapeDtypeStruct((A * P, E), jnp.float32),          # encoded prompts (flat)
    )
    return pl.pallas_call(
        functools.partial(_forward_kernel, B),
        out_shape=out_shapes,
        grid=(1,),
        in_specs=_full_block_specs(inputs),
        out_specs=_full_block_specs(out_shapes),
        compiler_params=pltpu.CompilerParams(dimension_semantics=("arbitrary",)),
    )(*inputs)


def _fused_losses(state_logits, state_labels, action_logits, action_labels,
                  task_logits, task_labels, sd_pred, sd_target):
    inputs = [
        state_logits.astype(jnp.float32), state_labels,
        action_logits.astype(jnp.float32), action_labels,
        task_logits.astype(jnp.float32), task_labels,
        sd_pred.astype(jnp.float32), sd_target.astype(jnp.float32),
    ]
    out_shape = jax.ShapeDtypeStruct((1, 4), jnp.float32)
    return pl.pallas_call(
        _loss_kernel,
        out_shape=out_shape,
        grid=(1,),
        in_specs=_full_block_specs(inputs),
        out_specs=_full_block_specs([out_shape])[0],
        compiler_params=pltpu.CompilerParams(dimension_semantics=("arbitrary",)),
    )(*inputs)


# ----------------------------------------------------------------------------
# ProcedureModel (eval-mode forward) built on the fused Pallas kernels
# ----------------------------------------------------------------------------
class ProcedureModelPallas:
    def __init__(self, vis_input_dim, lang_input_dim, embed_dim, time_horz,
                 num_classes, num_tasks, key):
        self.vis_input_dim = vis_input_dim
        self.lang_input_dim = lang_input_dim
        self.embed_dim = embed_dim
        self.time_horz = time_horz
        self.num_classes = num_classes
        self.num_tasks = num_tasks
        self.params = self._init_params(key)

    def _init_params(self, key):
        E = self.embed_dim
        ks = jax.random.split(key, 9)
        # matmul weights stored in bf16 (MXU fast path, f32 accumulation in-kernel)
        w = lambda k, shape: (0.02 * jax.random.normal(k, shape, dtype=jnp.float32)
                              ).astype(jnp.bfloat16)
        b = lambda n: jnp.zeros((1, n), jnp.float32)
        return {
            # StateEncoder projections
            "W_vis": w(ks[0], (self.vis_input_dim, E)), "b_vis": b(E),
            "W_lang": w(ks[1], (self.lang_input_dim, E)), "b_lang": b(E),
            # task decoder: Linear(2E->E) split into start/end halves, then Linear(E->num_tasks)
            "W_t1a": w(ks[2], (E, E)), "W_t1b": w(ks[3], (E, E)), "b_t1": b(E),
            "W_t2": w(ks[4], (E, self.num_tasks)), "b_t2": b(self.num_tasks),
            # StateDecoder
            "W_task_embed": w(ks[5], (self.num_tasks, E)),
            "W_dec": w(ks[6], (E, E)), "b_dec": b(E),
            # ActionDecoder: Linear(2E->E) split into (state_t, state_{t+1}) halves
            "W_act_a": w(ks[7], (E, E)), "W_act_b": w(ks[8], (E, E)), "b_act": b(E),
        }

    # structural constants (averaging / interpolation / pair-selection matrices)
    def _build_consts(self, B, T, A, P):
        f32 = jnp.float32
        half = P // 2
        col = jnp.arange(A * P)
        col_a = col // P
        col_p = col % P
        same = (jnp.arange(A)[:, None] == col_a[None, :])
        avg_before = jnp.where(same & (col_p[None, :] < half), 1.0 / half, 0.0).astype(f32)
        avg_after = jnp.where(same & (col_p[None, :] >= half), 1.0 / (P - half), 0.0).astype(f32)
        avg_all = jnp.where(same, 1.0 / P, 0.0).astype(f32)

        r = jnp.arange(B * (T + 1))
        rb = r // (T + 1)
        alpha = (r % (T + 1)).astype(f32) / float(T)
        hit = (jnp.arange(B)[None, :] == rb[:, None])
        mix_s = jnp.where(hit, (1.0 - alpha)[:, None], 0.0).astype(f32)
        mix_e = jnp.where(hit, alpha[:, None], 0.0).astype(f32)
        mix_t = hit.astype(f32)

        q = jnp.arange(B * T)
        src = (q // T) * (T + 1) + (q % T)
        cols2 = jnp.arange(B * (T + 1))
        sel_l = (cols2[None, :] == src[:, None]).astype(f32)
        sel_r = (cols2[None, :] == (src + 1)[:, None]).astype(f32)
        return dict(avg_before=avg_before, avg_after=avg_after, avg_all=avg_all,
                    mix_s=mix_s, mix_e=mix_e, mix_t=mix_t, sel_l=sel_l, sel_r=sel_r)

    # ---------------- forward_once: one fused pallas_call ----------------
    def forward_once(self, visual_features, state_prompt_features, tasks):
        B = visual_features.shape[0]
        T = self.time_horz
        A, P, _ = state_prompt_features.shape
        E = self.embed_dim
        NT = self.num_tasks

        start_obs = visual_features[:, 0, 0, :]
        end_obs = visual_features[:, -1, 1, :]
        obs = jnp.concatenate([start_obs, end_obs], axis=0).astype(jnp.bfloat16)     # [2B, vis]
        prompts_flat = state_prompt_features.reshape(A * P, -1).astype(jnp.bfloat16)  # [A*P, lang]

        consts = self._build_consts(B, T, A, P)
        (slog_s, slog_e, task_pred, decoded_flat, action_logits_flat,
         prompts_enc_flat) = _fused_forward(self.params, consts, obs, prompts_flat,
                                            (B, T, A, P, E, NT))

        state_logits = jnp.stack([slog_s, slog_e], axis=1)            # [B, 2, A]
        state_feat_decode = decoded_flat.reshape(B, T + 1, E)         # [B, T+1, E]
        prompts_enc = prompts_enc_flat.reshape(A, P, E)               # [A, P, E]
        action_logits = action_logits_flat.reshape(B, T, A)           # [B, T, A]

        # eval-mode branch (task_pred.argmax) is used inside the fused kernel implicitly;
        # the argmax-conditioned path of the reference ActionDecoder is approximated as before.
        return self.process_outputs(prompts_enc, state_logits, state_feat_decode,
                                    action_logits, task_pred)

    def process_outputs(self, state_prompt_features, state_logits, state_feat_decode,
                        action_logits, task_pred, pred_viterbi=None):
        _, _, num_action = state_logits.shape
        return {
            "state_encode": state_logits.reshape(-1, num_action),
            "state_decode": state_feat_decode[:, 1:-1, :],
            "action": action_logits.reshape(-1, num_action),
            "task": task_pred,
            "state_prompt_features": state_prompt_features,
            "pred_viterbi": pred_viterbi,
        }

    # ---------------- labels & losses (one fused pallas_call) ----------------
    def process_state_prompts(self, state_prompt_features, actions):
        B, T = actions.shape
        A, P, E = state_prompt_features.shape
        spf = state_prompt_features[actions.reshape(-1)].reshape(B, T, P, E)
        h = P // 2
        before = jnp.concatenate([spf[:, :, :h, :], spf[:, -1:, h:, :]], axis=1)
        after = jnp.concatenate([spf[:, :1, :h, :], spf[:, :, h:, :]], axis=1)
        target = jnp.concatenate([before, after], axis=2)             # [B, T+1, *, E]
        target = jnp.mean(target, axis=2)[:, 1:-1, :].reshape(-1, E)
        return jax.lax.stop_gradient(target)

    def process_labels(self, outputs, actions, tasks):
        return {
            "state": jnp.stack([actions[:, 0], actions[:, -1]], axis=1).reshape(-1),
            "action": actions.reshape(-1),
            "task": tasks,
            "state_decode": self.process_state_prompts(
                outputs["state_prompt_features"], actions),
        }

    def forward_loss(self, outputs, actions, tasks):
        E = self.embed_dim
        num_action = outputs["action"].shape[-1]
        labels = self.process_labels(outputs, actions, tasks)
        vec = _fused_losses(
            outputs["state_encode"].reshape(-1, num_action),
            labels["state"].reshape(-1, 1).astype(jnp.int32),
            outputs["action"].reshape(-1, num_action),
            labels["action"].reshape(-1, 1).astype(jnp.int32),
            outputs["task"],
            labels["task"].reshape(-1, 1).astype(jnp.int32),
            outputs["state_decode"].reshape(-1, E),
            labels["state_decode"],
        )
        losses = {
            "state_encode": vec[0, 0],
            "state_decode": vec[0, 1],
            "action": vec[0, 2],
            "task": vec[0, 3],
        }
        return labels, losses

    # ---------------- forward ----------------
    def forward(self, visual_features, state_prompt_features, actions, tasks,
                transition_matrix=None):
        outputs = self.forward_once(visual_features, state_prompt_features, tasks)
        # The reference only consumes softmax(action_logits) on the viterbi path
        # (transition_matrix is not None); the dead softmax is skipped otherwise.
        # TODO(synk): viterbi_path (sequential DP with numpy backtracking) has no clean
        # Pallas equivalent; only the transition_matrix=None path is implemented.
        outputs["pred_viterbi"] = None
        labels, losses = self.forward_loss(outputs, actions, tasks)
        return outputs, labels, losses


# ----------------------------------------------------------------------------
# Demo
# ----------------------------------------------------------------------------
if __name__ == "__main__":
    key = jax.random.PRNGKey(0)
    k_vis, k_lang, k_act, k_task, k_param = jax.random.split(key, 5)

    batch_size = 2
    time_horz = 3
    vis_input_dim = 64
    lang_input_dim = 64
    embed_dim = 32
    num_classes = 8      # num_action
    num_prompts = 4
    num_tasks = 4

    visual_features = jax.random.normal(
        k_vis, (batch_size, time_horz, 2, vis_input_dim), dtype=jnp.float32)
    state_prompt_features = jax.random.normal(
        k_lang, (num_classes, num_prompts, lang_input_dim), dtype=jnp.float32)
    actions = jax.random.randint(k_act, (batch_size, time_horz), 0, num_classes)
    tasks = jax.random.randint(k_task, (batch_size,), 0, num_tasks)

    model = ProcedureModelPallas(vis_input_dim, lang_input_dim, embed_dim,
                                 time_horz, num_classes, num_tasks, k_param)

    fwd = jax.jit(model.forward)
    outputs, labels, losses = fwd(visual_features, state_prompt_features, actions, tasks)

    jax.block_until_ready(outputs["action"])
    jax.block_until_ready(outputs["task"])
    for v in losses.values():
        jax.block_until_ready(v)

    print("KERNEL_OK")
</pallas_src>

<mosaic_0001>
module attributes {stable_mosaic.version = 11 : i64} {
  func.func @_forward_kernel(%arg0: i32, %arg1: memref<4x64xbf16, #tpu.memory_space<vmem>>, %arg2: memref<32x64xbf16, #tpu.memory_space<vmem>>, %arg3: memref<64x32xbf16, #tpu.memory_space<vmem>>, %arg4: memref<1x32xf32, #tpu.memory_space<vmem>>, %arg5: memref<64x32xbf16, #tpu.memory_space<vmem>>, %arg6: memref<1x32xf32, #tpu.memory_space<vmem>>, %arg7: memref<8x32xf32, #tpu.memory_space<vmem>>, %arg8: memref<8x32xf32, #tpu.memory_space<vmem>>, %arg9: memref<8x32xf32, #tpu.memory_space<vmem>>, %arg10: memref<32x32xbf16, #tpu.memory_space<vmem>>, %arg11: memref<32x32xbf16, #tpu.memory_space<vmem>>, %arg12: memref<1x32xf32, #tpu.memory_space<vmem>>, %arg13: memref<32x4xbf16, #tpu.memory_space<vmem>>, %arg14: memref<1x4xf32, #tpu.memory_space<vmem>>, %arg15: memref<4x32xbf16, #tpu.memory_space<vmem>>, %arg16: memref<8x2xf32, #tpu.memory_space<vmem>>, %arg17: memref<8x2xf32, #tpu.memory_space<vmem>>, %arg18: memref<8x2xf32, #tpu.memory_space<vmem>>, %arg19: memref<32x32xbf16, #tpu.memory_space<vmem>>, %arg20: memref<1x32xf32, #tpu.memory_space<vmem>>, %arg21: memref<6x8xf32, #tpu.memory_space<vmem>>, %arg22: memref<6x8xf32, #tpu.memory_space<vmem>>, %arg23: memref<32x32xbf16, #tpu.memory_space<vmem>>, %arg24: memref<32x32xbf16, #tpu.memory_space<vmem>>, %arg25: memref<1x32xf32, #tpu.memory_space<vmem>>, %arg26: memref<2x8xf32, #tpu.memory_space<vmem>>, %arg27: memref<2x8xf32, #tpu.memory_space<vmem>>, %arg28: memref<2x4xf32, #tpu.memory_space<vmem>>, %arg29: memref<8x32xf32, #tpu.memory_space<vmem>>, %arg30: memref<6x8xf32, #tpu.memory_space<vmem>>, %arg31: memref<32x32xf32, #tpu.memory_space<vmem>>) attributes {dimension_semantics = [#tpu.dimension_semantics<arbitrary>], iteration_bounds = array<i64: 1>, scalar_prefetch = 0 : i64, scratch_operands = 0 : i64, tpu.core_type = #tpu.core_type<tc>, window_params = [{pipeline_mode = #tpu.pipeline_mode<synchronous>, transform_indices = @transform_0, window_bounds = array<i64: 4, 64>}, {pipeline_mode = #tpu.pipeline_mode<synchronous>, transform_indices = @transform_1, window_bounds = array<i64: 32, 64>}, {pipeline_mode = #tpu.pipeline_mode<synchronous>, transform_indices = @transform_2, window_bounds = array<i64: 64, 32>}, {pipeline_mode = #tpu.pipeline_mode<synchronous>, transform_indices = @transform_3, window_bounds = array<i64: 1, 32>}, {pipeline_mode = #tpu.pipeline_mode<synchronous>, transform_indices = @transform_4, window_bounds = array<i64: 64, 32>}, {pipeline_mode = #tpu.pipeline_mode<synchronous>, transform_indices = @transform_5, window_bounds = array<i64: 1, 32>}, {pipeline_mode = #tpu.pipeline_mode<synchronous>, transform_indices = @transform_6, window_bounds = array<i64: 8, 32>}, {pipeline_mode = #tpu.pipeline_mode<synchronous>, transform_indices = @transform_7, window_bounds = array<i64: 8, 32>}, {pipeline_mode = #tpu.pipeline_mode<synchronous>, transform_indices = @transform_8, window_bounds = array<i64: 8, 32>}, {pipeline_mode = #tpu.pipeline_mode<synchronous>, transform_indices = @transform_9, window_bounds = array<i64: 32, 32>}, {pipeline_mode = #tpu.pipeline_mode<synchronous>, transform_indices = @transform_10, window_bounds = array<i64: 32, 32>}, {pipeline_mode = #tpu.pipeline_mode<synchronous>, transform_indices = @transform_11, window_bounds = array<i64: 1, 32>}, {pipeline_mode = #tpu.pipeline_mode<synchronous>, transform_indices = @transform_12, window_bounds = array<i64: 32, 4>}, {pipeline_mode = #tpu.pipeline_mode<synchronous>, transform_indices = @transform_13, window_bounds = array<i64: 1, 4>}, {pipeline_mode = #tpu.pipeline_mode<synchronous>, transform_indices = @transform_14, window_bounds = array<i64: 4, 32>}, {pipeline_mode = #tpu.pipeline_mode<synchronous>, transform_indices = @transform_15, window_bounds = array<i64: 8, 2>}, {pipeline_mode = #tpu.pipeline_mode<synchronous>, transform_indices = @transform_16, window_bounds = array<i64: 8, 2>}, {pipeline_mode = #tpu.pipeline_mode<synchronous>, transform_indices = @transform_17, window_bounds = array<i64: 8, 2>}, {pipeline_mode = #tpu.pipeline_mode<synchronous>, transform_indices = @transform_18, window_bounds = array<i64: 32, 32>}, {pipeline_mode = #tpu.pipeline_mode<synchronous>, transform_indices = @transform_19, window_bounds = array<i64: 1, 32>}, {pipeline_mode = #tpu.pipeline_mode<synchronous>, transform_indices = @transform_20, window_bounds = array<i64: 6, 8>}, {pipeline_mode = #tpu.pipeline_mode<synchronous>, transform_indices = @transform_21, window_bounds = array<i64: 6, 8>}, {pipeline_mode = #tpu.pipeline_mode<synchronous>, transform_indices = @transform_22, window_bounds = array<i64: 32, 32>}, {pipeline_mode = #tpu.pipeline_mode<synchronous>, transform_indices = @transform_23, window_bounds = array<i64: 32, 32>}, {pipeline_mode = #tpu.pipeline_mode<synchronous>, transform_indices = @transform_24, window_bounds = array<i64: 1, 32>}, {pipeline_mode = #tpu.pipeline_mode<synchronous>, transform_indices = @transform_25, window_bounds = array<i64: 2, 8>}, {pipeline_mode = #tpu.pipeline_mode<synchronous>, transform_indices = @transform_26, window_bounds = array<i64: 2, 8>}, {pipeline_mode = #tpu.pipeline_mode<synchronous>, transform_indices = @transform_27, window_bounds = array<i64: 2, 4>}, {pipeline_mode = #tpu.pipeline_mode<synchronous>, transform_indices = @transform_28, window_bounds = array<i64: 8, 32>}, {pipeline_mode = #tpu.pipeline_mode<synchronous>, transform_indices = @transform_29, window_bounds = array<i64: 6, 8>}, {pipeline_mode = #tpu.pipeline_mode<synchronous>, transform_indices = @transform_30, window_bounds = array<i64: 32, 32>}]} {
    %c0 = arith.constant 0 : index
    %c0_0 = arith.constant 0 : index
    %0 = vector.load %arg1[%c0, %c0_0] : memref<4x64xbf16, #tpu.memory_space<vmem>>, vector<4x64xbf16>
    %c0_1 = arith.constant 0 : index
    %c0_2 = arith.constant 0 : index
    %1 = vector.load %arg3[%c0_1, %c0_2] : memref<64x32xbf16, #tpu.memory_space<vmem>>, vector<64x32xbf16>
    %cst = arith.constant dense<0.000000e+00> : vector<4x32xf32>
    %2 = tpu.matmul %0, %1, %cst {dimension_numbers = #tpu.dot_dimension_numbers<[1], [0], [0], [1], [0, 0, 1, 1], [], []>} : vector<4x64xbf16>, vector<64x32xbf16>, vector<4x32xf32> -> vector<4x32xf32>
    %c0_3 = arith.constant 0 : index
    %c0_4 = arith.constant 0 : index
    %3 = vector.load %arg4[%c0_3, %c0_4] : memref<1x32xf32, #tpu.memory_space<vmem>>, vector<1x32xf32>
    %4 = vector.broadcast %3 : vector<1x32xf32> to vector<4x32xf32>
    %5 = arith.addf %2, %4 : vector<4x32xf32>
    %6 = vector.extract_strided_slice %5 {offsets = [0, 0], sizes = [2, 32], strides = [1, 1]} : vector<4x32xf32> to vector<2x32xf32>
    %7 = vector.extract_strided_slice %5 {offsets = [2, 0], sizes = [2, 32], strides = [1, 1]} : vector<4x32xf32> to vector<2x32xf32>
    %c0_5 = arith.constant 0 : index
    %c0_6 = arith.constant 0 : index
    %8 = vector.load %arg2[%c0_5, %c0_6] : memref<32x64xbf16, #tpu.memory_space<vmem>>, vector<32x64xbf16>
    %c0_7 = arith.constant 0 : index
    %c0_8 = arith.constant 0 : index
    %9 = vector.load %arg5[%c0_7, %c0_8] : memref<64x32xbf16, #tpu.memory_space<vmem>>, vector<64x32xbf16>
    %cst_9 = arith.constant dense<0.000000e+00> : vector<32x32xf32>
    %10 = tpu.matmul %8, %9, %cst_9 {dimension_numbers = #tpu.dot_dimension_numbers<[1], [0], [0], [1], [0, 0, 1, 1], [], []>} : vector<32x64xbf16>, vector<64x32xbf16>, vector<32x32xf32> -> vector<32x32xf32>
    %c0_10 = arith.constant 0 : index
    %c0_11 = arith.constant 0 : index
    %11 = vector.load %arg6[%c0_10, %c0_11] : memref<1x32xf32, #tpu.memory_space<vmem>>, vector<1x32xf32>
    %12 = vector.broadcast %11 : vector<1x32xf32> to vector<32x32xf32>
    %13 = arith.addf %10, %12 : vector<32x32xf32>
    %c0_12 = arith.constant 0 : index
    %c0_13 = arith.constant 0 : index
    %14 = vector.load %arg31[%c0_12, %c0_13] : memref<32x32xf32, #tpu.memory_space<vmem>>, vector<32x32xf32>
    tpu.vector_store %arg31[%c0_12, %c0_13], %13 {strides = array<i32>} : memref<32x32xf32, #tpu.memory_space<vmem>>, vector<32x32xf32>,
    %c0_14 = arith.constant 0 : index
    %c0_15 = arith.constant 0 : index
    %15 = vector.load %arg7[%c0_14, %c0_15] : memref<8x32xf32, #tpu.memory_space<vmem>>, vector<8x32xf32>
    %cst_16 = arith.constant dense<0.000000e+00> : vector<8x32xf32>
    %16 = tpu.matmul %15, %13, %cst_16 {dimension_numbers = #tpu.dot_dimension_numbers<[1], [0], [0], [1], [0, 0, 1, 1], [], []>} : vector<8x32xf32>, vector<32x32xf32>, vector<8x32xf32> -> vector<8x32xf32>
    %c0_17 = arith.constant 0 : index
    %c0_18 = arith.constant 0 : index
    %17 = vector.load %arg8[%c0_17, %c0_18] : memref<8x32xf32, #tpu.memory_space<vmem>>, vector<8x32xf32>
    %cst_19 = arith.constant dense<0.000000e+00> : vector<8x32xf32>
    %18 = tpu.matmul %17, %13, %cst_19 {dimension_numbers = #tpu.dot_dimension_numbers<[1], [0], [0], [1], [0, 0, 1, 1], [], []>} : vector<8x32xf32>, vector<32x32xf32>, vector<8x32xf32> -> vector<8x32xf32>
    %c0_20 = arith.constant 0 : index
    %c0_21 = arith.constant 0 : index
    %19 = vector.load %arg9[%c0_20, %c0_21] : memref<8x32xf32, #tpu.memory_space<vmem>>, vector<8x32xf32>
    %cst_22 = arith.constant dense<0.000000e+00> : vector<8x32xf32>
    %20 = tpu.matmul %19, %13, %cst_22 {dimension_numbers = #tpu.dot_dimension_numbers<[1], [0], [0], [1], [0, 0, 1, 1], [], []>} : vector<8x32xf32>, vector<32x32xf32>, vector<8x32xf32> -> vector<8x32xf32>
    %21 = tpu.transpose %16, [1, 0] : vector<8x32xf32> -> vector<32x8xf32>
    %cst_23 = arith.constant dense<0.000000e+00> : vector<2x8xf32>
    %22 = tpu.matmul %6, %21, %cst_23 {dimension_numbers = #tpu.dot_dimension_numbers<[1], [0], [0], [1], [0, 0, 1, 1], [], []>} : vector<2x32xf32>, vector<32x8xf32>, vector<2x8xf32> -> vector<2x8xf32>
    %c0_24 = arith.constant 0 : index
    %c0_25 = arith.constant 0 : index
    %23 = vector.load %arg26[%c0_24, %c0_25] : memref<2x8xf32, #tpu.memory_space<vmem>>, vector<2x8xf32>
    tpu.vector_store %arg26[%c0_24, %c0_25], %22 {strides = array<i32>} : memref<2x8xf32, #tpu.memory_space<vmem>>, vector<2x8xf32>,
    %24 = tpu.transpose %18, [1, 0] : vector<8x32xf32> -> vector<32x8xf32>
    %cst_26 = arith.constant dense<0.000000e+00> : vector<2x8xf32>
    %25 = tpu.matmul %7, %24, %cst_26 {dimension_numbers = #tpu.dot_dimension_numbers<[1], [0], [0], [1], [0, 0, 1, 1], [], []>} : vector<2x32xf32>, vector<32x8xf32>, vector<2x8xf32> -> vector<2x8xf32>
    %c0_27 = arith.constant 0 : index
    %c0_28 = arith.constant 0 : index
    %26 = vector.load %arg27[%c0_27, %c0_28] : memref<2x8xf32, #tpu.memory_space<vmem>>, vector<2x8xf32>
    tpu.vector_store %arg27[%c0_27, %c0_28], %25 {strides = array<i32>} : memref<2x8xf32, #tpu.memory_space<vmem>>, vector<2x8xf32>,
    %27 = arith.truncf %6 : vector<2x32xf32> to vector<2x32xbf16>
    %c0_29 = arith.constant 0 : index
    %c0_30 = arith.constant 0 : index
    %28 = vector.load %arg10[%c0_29, %c0_30] : memref<32x32xbf16, #tpu.memory_space<vmem>>, vector<32x32xbf16>
    %cst_31 = arith.constant dense<0.000000e+00> : vector<2x32xf32>
    %29 = tpu.matmul %27, %28, %cst_31 {dimension_numbers = #tpu.dot_dimension_numbers<[1], [0], [0], [1], [0, 0, 1, 1], [], []>} : vector<2x32xbf16>, vector<32x32xbf16>, vector<2x32xf32> -> vector<2x32xf32>
    %30 = arith.truncf %7 : vector<2x32xf32> to vector<2x32xbf16>
    %c0_32 = arith.constant 0 : index
    %c0_33 = arith.constant 0 : index
    %31 = vector.load %arg11[%c0_32, %c0_33] : memref<32x32xbf16, #tpu.memory_space<vmem>>, vector<32x32xbf16>
    %cst_34 = arith.constant dense<0.000000e+00> : vector<2x32xf32>
    %32 = tpu.matmul %30, %31, %cst_34 {dimension_numbers = #tpu.dot_dimension_numbers<[1], [0], [0], [1], [0, 0, 1, 1], [], []>} : vector<2x32xbf16>, vector<32x32xbf16>, vector<2x32xf32> -> vector<2x32xf32>
    %33 = arith.addf %29, %32 : vector<2x32xf32>
    %c0_35 = arith.constant 0 : index
    %c0_36 = arith.constant 0 : index
    %34 = vector.load %arg12[%c0_35, %c0_36] : memref<1x32xf32, #tpu.memory_space<vmem>>, vector<1x32xf32>
    %35 = vector.broadcast %34 : vector<1x32xf32> to vector<2x32xf32>
    %36 = arith.addf %33, %35 : vector<2x32xf32>
    %cst_37 = arith.constant 0.000000e+00 : f32
    %37 = vector.broadcast %cst_37 : f32 to vector<2x32xf32>
    %38 = arith.maximumf %36, %37 : vector<2x32xf32>
    %39 = arith.truncf %38 : vector<2x32xf32> to vector<2x32xbf16>
    %c0_38 = arith.constant 0 : index
    %c0_39 = arith.constant 0 : index
    %40 = vector.load %arg13[%c0_38, %c0_39] : memref<32x4xbf16, #tpu.memory_space<vmem>>, vector<32x4xbf16>
    %cst_40 = arith.constant dense<0.000000e+00> : vector<2x4xf32>
    %41 = tpu.matmul %39, %40, %cst_40 {dimension_numbers = #tpu.dot_dimension_numbers<[1], [0], [0], [1], [0, 0, 1, 1], [], []>} : vector<2x32xbf16>, vector<32x4xbf16>, vector<2x4xf32> -> vector<2x4xf32>
    %c0_41 = arith.constant 0 : index
    %c0_42 = arith.constant 0 : index
    %42 = vector.load %arg14[%c0_41, %c0_42] : memref<1x4xf32, #tpu.memory_space<vmem>>, vector<1x4xf32>
    %43 = vector.broadcast %42 : vector<1x4xf32> to vector<2x4xf32>
    %44 = arith.addf %41, %43 : vector<2x4xf32>
    %c0_43 = arith.constant 0 : index
    %c0_44 = arith.constant 0 : index
    %45 = vector.load %arg28[%c0_43, %c0_44] : memref<2x4xf32, #tpu.memory_space<vmem>>, vector<2x4xf32>
    tpu.vector_store %arg28[%c0_43, %c0_44], %44 {strides = array<i32>} : memref<2x4xf32, #tpu.memory_space<vmem>>, vector<2x4xf32>,
    %cst_45 = arith.constant dense<0xFF800000> : vector<2xf32>
    %46 = vector.multi_reduction <maximumf>, %44, %cst_45 [1] : vector<2x4xf32> to vector<2xf32>
    %47 = vector.shape_cast %46 : vector<2xf32> to vector<2x1xf32>
    %48 = vector.broadcast %47 : vector<2x1xf32> to vector<2x4xf32>
    %49 = arith.subf %44, %48 : vector<2x4xf32>
    %50 = math.exp %49 : vector<2x4xf32>
    %cst_46 = arith.constant dense<0.000000e+00> : vector<2xf32>
    %51 = vector.multi_reduction <add>, %50, %cst_46 [1] : vector<2x4xf32> to vector<2xf32>
    %52 = vector.shape_cast %51 : vector<2xf32> to vector<2x1xf32>
    %53 = vector.broadcast %52 : vector<2x1xf32> to vector<2x4xf32>
    %54 = arith.divf %50, %53 : vector<2x4xf32>
    %55 = arith.truncf %54 : vector<2x4xf32> to vector<2x4xbf16>
    %c0_47 = arith.constant 0 : index
    %c0_48 = arith.constant 0 : index
    %56 = vector.load %arg15[%c0_47, %c0_48] : memref<4x32xbf16, #tpu.memory_space<vmem>>, vector<4x32xbf16>
    %cst_49 = arith.constant dense<0.000000e+00> : vector<2x32xf32>
    %57 = tpu.matmul %55, %56, %cst_49 {dimension_numbers = #tpu.dot_dimension_numbers<[1], [0], [0], [1], [0, 0, 1, 1], [], []>} : vector<2x4xbf16>, vector<4x32xbf16>, vector<2x32xf32> -> vector<2x32xf32>
    %c0_50 = arith.constant 0 : index
    %c0_51 = arith.constant 0 : index
    %58 = vector.load %arg16[%c0_50, %c0_51] : memref<8x2xf32, #tpu.memory_space<vmem>>, vector<8x2xf32>
    %cst_52 = arith.constant dense<0.000000e+00> : vector<8x32xf32>
    %59 = tpu.matmul %58, %6, %cst_52 {dimension_numbers = #tpu.dot_dimension_numbers<[1], [0], [0], [1], [0, 0, 1, 1], [], []>} : vector<8x2xf32>, vector<2x32xf32>, vector<8x32xf32> -> vector<8x32xf32>
    %c0_53 = arith.constant 0 : index
    %c0_54 = arith.constant 0 : index
    %60 = vector.load %arg17[%c0_53, %c0_54] : memref<8x2xf32, #tpu.memory_space<vmem>>, vector<8x2xf32>
    %cst_55 = arith.constant dense<0.000000e+00> : vector<8x32xf32>
    %61 = tpu.matmul %60, %7, %cst_55 {dimension_numbers = #tpu.dot_dimension_numbers<[1], [0], [0], [1], [0, 0, 1, 1], [], []>} : vector<8x2xf32>, vector<2x32xf32>, vector<8x32xf32> -> vector<8x32xf32>
    %62 = arith.addf %59, %61 : vector<8x32xf32>
    %c0_56 = arith.constant 0 : index
    %c0_57 = arith.constant 0 : index
    %63 = vector.load %arg18[%c0_56, %c0_57] : memref<8x2xf32, #tpu.memory_space<vmem>>, vector<8x2xf32>
    %cst_58 = arith.constant dense<0.000000e+00> : vector<8x32xf32>
    %64 = tpu.matmul %63, %57, %cst_58 {dimension_numbers = #tpu.dot_dimension_numbers<[1], [0], [0], [1], [0, 0, 1, 1], [], []>} : vector<8x2xf32>, vector<2x32xf32>, vector<8x32xf32> -> vector<8x32xf32>
    %65 = arith.addf %62, %64 : vector<8x32xf32>
    %66 = arith.truncf %65 : vector<8x32xf32> to vector<8x32xbf16>
    %c0_59 = arith.constant 0 : index
    %c0_60 = arith.constant 0 : index
    %67 = vector.load %arg19[%c0_59, %c0_60] : memref<32x32xbf16, #tpu.memory_space<vmem>>, vector<32x32xbf16>
    %cst_61 = arith.constant dense<0.000000e+00> : vector<8x32xf32>
    %68 = tpu.matmul %66, %67, %cst_61 {dimension_numbers = #tpu.dot_dimension_numbers<[1], [0], [0], [1], [0, 0, 1, 1], [], []>} : vector<8x32xbf16>, vector<32x32xbf16>, vector<8x32xf32> -> vector<8x32xf32>
    %c0_62 = arith.constant 0 : index
    %c0_63 = arith.constant 0 : index
    %69 = vector.load %arg20[%c0_62, %c0_63] : memref<1x32xf32, #tpu.memory_space<vmem>>, vector<1x32xf32>
    %70 = vector.broadcast %69 : vector<1x32xf32> to vector<8x32xf32>
    %71 = arith.addf %68, %70 : vector<8x32xf32>
    %c0_64 = arith.constant 0 : index
    %c0_65 = arith.constant 0 : index
    %72 = vector.load %arg29[%c0_64, %c0_65] : memref<8x32xf32, #tpu.memory_space<vmem>>, vector<8x32xf32>
    tpu.vector_store %arg29[%c0_64, %c0_65], %71 {strides = array<i32>} : memref<8x32xf32, #tpu.memory_space<vmem>>, vector<8x32xf32>,
    %c0_66 = arith.constant 0 : index
    %c0_67 = arith.constant 0 : index
    %73 = vector.load %arg21[%c0_66, %c0_67] : memref<6x8xf32, #tpu.memory_space<vmem>>, vector<6x8xf32>
    %cst_68 = arith.constant dense<0.000000e+00> : vector<6x32xf32>
    %74 = tpu.matmul %73, %71, %cst_68 {dimension_numbers = #tpu.dot_dimension_numbers<[1], [0], [0], [1], [0, 0, 1, 1], [], []>} : vector<6x8xf32>, vector<8x32xf32>, vector<6x32xf32> -> vector<6x32xf32>
    %c0_69 = arith.constant 0 : index
    %c0_70 = arith.constant 0 : index
    %75 = vector.load %arg22[%c0_69, %c0_70] : memref<6x8xf32, #tpu.memory_space<vmem>>, vector<6x8xf32>
    %cst_71 = arith.constant dense<0.000000e+00> : vector<6x32xf32>
    %76 = tpu.matmul %75, %71, %cst_71 {dimension_numbers = #tpu.dot_dimension_numbers<[1], [0], [0], [1], [0, 0, 1, 1], [], []>} : vector<6x8xf32>, vector<8x32xf32>, vector<6x32xf32> -> vector<6x32xf32>
    %77 = arith.truncf %74 : vector<6x32xf32> to vector<6x32xbf16>
    %c0_72 = arith.constant 0 : index
    %c0_73 = arith.constant 0 : index
    %78 = vector.load %arg23[%c0_72, %c0_73] : memref<32x32xbf16, #tpu.memory_space<vmem>>, vector<32x32xbf16>
    %cst_74 = arith.constant dense<0.000000e+00> : vector<6x32xf32>
    %79 = tpu.matmul %77, %78, %cst_74 {dimension_numbers = #tpu.dot_dimension_numbers<[1], [0], [0], [1], [0, 0, 1, 1], [], []>} : vector<6x32xbf16>, vector<32x32xbf16>, vector<6x32xf32> -> vector<6x32xf32>
    %80 = arith.truncf %76 : vector<6x32xf32> to vector<6x32xbf16>
    %c0_75 = arith.constant 0 : index
    %c0_76 = arith.constant 0 : index
    %81 = vector.load %arg24[%c0_75, %c0_76] : memref<32x32xbf16, #tpu.memory_space<vmem>>, vector<32x32xbf16>
    %cst_77 = arith.constant dense<0.000000e+00> : vector<6x32xf32>
    %82 = tpu.matmul %80, %81, %cst_77 {dimension_numbers = #tpu.dot_dimension_numbers<[1], [0], [0], [1], [0, 0, 1, 1], [], []>} : vector<6x32xbf16>, vector<32x32xbf16>, vector<6x32xf32> -> vector<6x32xf32>
    %83 = arith.addf %79, %82 : vector<6x32xf32>
    %c0_78 = arith.constant 0 : index
    %c0_79 = arith.constant 0 : index
    %84 = vector.load %arg25[%c0_78, %c0_79] : memref<1x32xf32, #tpu.memory_space<vmem>>, vector<1x32xf32>
    %85 = vector.broadcast %84 : vector<1x32xf32> to vector<6x32xf32>
    %86 = arith.addf %83, %85 : vector<6x32xf32>
    %cst_80 = arith.constant 0.000000e+00 : f32
    %87 = vector.broadcast %cst_80 : f32 to vector<6x32xf32>
    %88 = arith.maximumf %86, %87 : vector<6x32xf32>
    %89 = tpu.transpose %20, [1, 0] : vector<8x32xf32> -> vector<32x8xf32>
    %cst_81 = arith.constant dense<0.000000e+00> : vector<6x8xf32>
    %90 = tpu.matmul %88, %89, %cst_81 {dimension_numbers = #tpu.dot_dimension_numbers<[1], [0], [0], [1], [0, 0, 1, 1], [], []>} : vector<6x32xf32>, vector<32x8xf32>, vector<6x8xf32> -> vector<6x8xf32>
    %c0_82 = arith.constant 0 : index
    %c0_83 = arith.constant 0 : index
    %91 = vector.load %arg30[%c0_82, %c0_83] : memref<6x8xf32, #tpu.memory_space<vmem>>, vector<6x8xf32>
    tpu.vector_store %arg30[%c0_82, %c0_83], %90 {strides = array<i32>} : memref<6x8xf32, #tpu.memory_space<vmem>>, vector<6x8xf32>,
    return
  }
  func.func @transform_0(%arg0: i32) -> (i32, i32) {
    %c0_i32 = arith.constant 0 : i32
    %c0_i32_0 = arith.constant 0 : i32
    %c0_i32_1 = arith.constant 0 : i32
    return %c0_i32, %c0_i32_0 : i32, i32
  }
  func.func @transform_1(%arg0: i32) -> (i32, i32) {
    %c0_i32 = arith.constant 0 : i32
    %c0_i32_0 = arith.constant 0 : i32
    %c0_i32_1 = arith.constant 0 : i32
    return %c0_i32, %c0_i32_0 : i32, i32
  }
  func.func @transform_2(%arg0: i32) -> (i32, i32) {
    %c0_i32 = arith.constant 0 : i32
    %c0_i32_0 = arith.constant 0 : i32
    %c0_i32_1 = arith.constant 0 : i32
    return %c0_i32, %c0_i32_0 : i32, i32
  }
  func.func @transform_3(%arg0: i32) -> (i32, i32) {
    %c0_i32 = arith.constant 0 : i32
    %c0_i32_0 = arith.constant 0 : i32
    %c0_i32_1 = arith.constant 0 : i32
    return %c0_i32, %c0_i32_0 : i32, i32
  }
  func.func @transform_4(%arg0: i32) -> (i32, i32) {
    %c0_i32 = arith.constant 0 : i32
    %c0_i32_0 = arith.constant 0 : i32
    %c0_i32_1 = arith.constant 0 : i32
    return %c0_i32, %c0_i32_0 : i32, i32
  }
  func.func @transform_5(%arg0: i32) -> (i32, i32) {
    %c0_i32 = arith.constant 0 : i32
    %c0_i32_0 = arith.constant 0 : i32
    %c0_i32_1 = arith.constant 0 : i32
    return %c0_i32, %c0_i32_0 : i32, i32
  }
  func.func @transform_6(%arg0: i32) -> (i32, i32) {
    %c0_i32 = arith.constant 0 : i32
    %c0_i32_0 = arith.constant 0 : i32
    %c0_i32_1 = arith.constant 0 : i32
    return %c0_i32, %c0_i32_0 : i32, i32
  }
  func.func @transform_7(%arg0: i32) -> (i32, i32) {
    %c0_i32 = arith.constant 0 : i32
    %c0_i32_0 = arith.constant 0 : i32
    %c0_i32_1 = arith.constant 0 : i32
    return %c0_i32, %c0_i32_0 : i32, i32
  }
  func.func @transform_8(%arg0: i32) -> (i32, i32) {
    %c0_i32 = arith.constant 0 : i32
    %c0_i32_0 = arith.constant 0 : i32
    %c0_i32_1 = arith.constant 0 : i32
    return %c0_i32, %c0_i32_0 : i32, i32
  }
  func.func @transform_9(%arg0: i32) -> (i32, i32) {
    %c0_i32 = arith.constant 0 : i32
    %c0_i32_0 = arith.constant 0 : i32
    %c0_i32_1 = arith.constant 0 : i32
    return %c0_i32, %c0_i32_0 : i32, i32
  }
  func.func @transform_10(%arg0: i32) -> (i32, i32) {
    %c0_i32 = arith.constant 0 : i32
    %c0_i32_0 = arith.constant 0 : i32
    %c0_i32_1 = arith.constant 0 : i32
    return %c0_i32, %c0_i32_0 : i32, i32
  }
  func.func @transform_11(%arg0: i32) -> (i32, i32) {
    %c0_i32 = arith.constant 0 : i32
    %c0_i32_0 = arith.constant 0 : i32
    %c0_i32_1 = arith.constant 0 : i32
    return %c0_i32, %c0_i32_0 : i32, i32
  }
  func.func @transform_12(%arg0: i32) -> (i32, i32) {
    %c0_i32 = arith.constant 0 : i32
    %c0_i32_0 = arith.constant 0 : i32
    %c0_i32_1 = arith.constant 0 : i32
    return %c0_i32, %c0_i32_0 : i32, i32
  }
  func.func @transform_13(%arg0: i32) -> (i32, i32) {
    %c0_i32 = arith.constant 0 : i32
    %c0_i32_0 = arith.constant 0 : i32
    %c0_i32_1 = arith.constant 0 : i32
    return %c0_i32, %c0_i32_0 : i32, i32
  }
  func.func @transform_14(%arg0: i32) -> (i32, i32) {
    %c0_i32 = arith.constant 0 : i32
    %c0_i32_0 = arith.constant 0 : i32
    %c0_i32_1 = arith.constant 0 : i32
    return %c0_i32, %c0_i32_0 : i32, i32
  }
  func.func @transform_15(%arg0: i32) -> (i32, i32) {
    %c0_i32 = arith.constant 0 : i32
    %c0_i32_0 = arith.constant 0 : i32
    %c0_i32_1 = arith.constant 0 : i32
    return %c0_i32, %c0_i32_0 : i32, i32
  }
  func.func @transform_16(%arg0: i32) -> (i32, i32) {
    %c0_i32 = arith.constant 0 : i32
    %c0_i32_0 = arith.constant 0 : i32
    %c0_i32_1 = arith.constant 0 : i32
    return %c0_i32, %c0_i32_0 : i32, i32
  }
  func.func @transform_17(%arg0: i32) -> (i32, i32) {
    %c0_i32 = arith.constant 0 : i32
    %c0_i32_0 = arith.constant 0 : i32
    %c0_i32_1 = arith.constant 0 : i32
    return %c0_i32, %c0_i32_0 : i32, i32
  }
  func.func @transform_18(%arg0: i32) -> (i32, i32) {
    %c0_i32 = arith.constant 0 : i32
    %c0_i32_0 = arith.constant 0 : i32
    %c0_i32_1 = arith.constant 0 : i32
    return %c0_i32, %c0_i32_0 : i32, i32
  }
  func.func @transform_19(%arg0: i32) -> (i32, i32) {
    %c0_i32 = arith.constant 0 : i32
    %c0_i32_0 = arith.constant 0 : i32
    %c0_i32_1 = arith.constant 0 : i32
    return %c0_i32, %c0_i32_0 : i32, i32
  }
  func.func @transform_20(%arg0: i32) -> (i32, i32) {
    %c0_i32 = arith.constant 0 : i32
    %c0_i32_0 = arith.constant 0 : i32
    %c0_i32_1 = arith.constant 0 : i32
    return %c0_i32, %c0_i32_0 : i32, i32
  }
  func.func @transform_21(%arg0: i32) -> (i32, i32) {
    %c0_i32 = arith.constant 0 : i32
    %c0_i32_0 = arith.constant 0 : i32
    %c0_i32_1 = arith.constant 0 : i32
    return %c0_i32, %c0_i32_0 : i32, i32
  }
  func.func @transform_22(%arg0: i32) -> (i32, i32) {
    %c0_i32 = arith.constant 0 : i32
    %c0_i32_0 = arith.constant 0 : i32
    %c0_i32_1 = arith.constant 0 : i32
    return %c0_i32, %c0_i32_0 : i32, i32
  }
  func.func @transform_23(%arg0: i32) -> (i32, i32) {
    %c0_i32 = arith.constant 0 : i32
    %c0_i32_0 = arith.constant 0 : i32
    %c0_i32_1 = arith.constant 0 : i32
    return %c0_i32, %c0_i32_0 : i32, i32
  }
  func.func @transform_24(%arg0: i32) -> (i32, i32) {
    %c0_i32 = arith.constant 0 : i32
    %c0_i32_0 = arith.constant 0 : i32
    %c0_i32_1 = arith.constant 0 : i32
    return %c0_i32, %c0_i32_0 : i32, i32
  }
  func.func @transform_25(%arg0: i32) -> (i32, i32) {
    %c0_i32 = arith.constant 0 : i32
    %c0_i32_0 = arith.constant 0 : i32
    %c0_i32_1 = arith.constant 0 : i32
    return %c0_i32, %c0_i32_0 : i32, i32
  }
  func.func @transform_26(%arg0: i32) -> (i32, i32) {
    %c0_i32 = arith.constant 0 : i32
    %c0_i32_0 = arith.constant 0 : i32
    %c0_i32_1 = arith.constant 0 : i32
    return %c0_i32, %c0_i32_0 : i32, i32
  }
  func.func @transform_27(%arg0: i32) -> (i32, i32) {
    %c0_i32 = arith.constant 0 : i32
    %c0_i32_0 = arith.constant 0 : i32
    %c0_i32_1 = arith.constant 0 : i32
    return %c0_i32, %c0_i32_0 : i32, i32
  }
  func.func @transform_28(%arg0: i32) -> (i32, i32) {
    %c0_i32 = arith.constant 0 : i32
    %c0_i32_0 = arith.constant 0 : i32
    %c0_i32_1 = arith.constant 0 : i32
    return %c0_i32, %c0_i32_0 : i32, i32
  }
  func.func @transform_29(%arg0: i32) -> (i32, i32) {
    %c0_i32 = arith.constant 0 : i32
    %c0_i32_0 = arith.constant 0 : i32
    %c0_i32_1 = arith.constant 0 : i32
    return %c0_i32, %c0_i32_0 : i32, i32
  }
  func.func @transform_30(%arg0: i32) -> (i32, i32) {
    %c0_i32 = arith.constant 0 : i32
    %c0_i32_0 = arith.constant 0 : i32
    %c0_i32_1 = arith.constant 0 : i32
    return %c0_i32, %c0_i32_0 : i32, i32
  }
}

module attributes {stable_mosaic.version = 11 : i64} {
  func.func @_loss_kernel(%arg0: i32, %arg1: memref<4x8xf32, #tpu.memory_space<vmem>>, %arg2: memref<4x1xi32, #tpu.memory_space<vmem>>, %arg3: memref<6x8xf32, #tpu.memory_space<vmem>>, %arg4: memref<6x1xi32, #tpu.memory_space<vmem>>, %arg5: memref<2x4xf32, #tpu.memory_space<vmem>>, %arg6: memref<2x1xi32, #tpu.memory_space<vmem>>, %arg7: memref<4x32xf32, #tpu.memory_space<vmem>>, %arg8: memref<4x32xf32, #tpu.memory_space<vmem>>, %arg9: memref<1x4xf32, #tpu.memory_space<vmem>>) attributes {dimension_semantics = [#tpu.dimension_semantics<arbitrary>], iteration_bounds = array<i64: 1>, scalar_prefetch = 0 : i64, scratch_operands = 0 : i64, tpu.core_type = #tpu.core_type<tc>, window_params = [{pipeline_mode = #tpu.pipeline_mode<synchronous>, transform_indices = @transform_0, window_bounds = array<i64: 4, 8>}, {pipeline_mode = #tpu.pipeline_mode<synchronous>, transform_indices = @transform_1, window_bounds = array<i64: 4, 1>}, {pipeline_mode = #tpu.pipeline_mode<synchronous>, transform_indices = @transform_2, window_bounds = array<i64: 6, 8>}, {pipeline_mode = #tpu.pipeline_mode<synchronous>, transform_indices = @transform_3, window_bounds = array<i64: 6, 1>}, {pipeline_mode = #tpu.pipeline_mode<synchronous>, transform_indices = @transform_4, window_bounds = array<i64: 2, 4>}, {pipeline_mode = #tpu.pipeline_mode<synchronous>, transform_indices = @transform_5, window_bounds = array<i64: 2, 1>}, {pipeline_mode = #tpu.pipeline_mode<synchronous>, transform_indices = @transform_6, window_bounds = array<i64: 4, 32>}, {pipeline_mode = #tpu.pipeline_mode<synchronous>, transform_indices = @transform_7, window_bounds = array<i64: 4, 32>}, {pipeline_mode = #tpu.pipeline_mode<synchronous>, transform_indices = @transform_8, window_bounds = array<i64: 1, 4>}]} {
    %c0 = arith.constant 0 : index
    %c0_0 = arith.constant 0 : index
    %0 = vector.load %arg1[%c0, %c0_0] : memref<4x8xf32, #tpu.memory_space<vmem>>, vector<4x8xf32>
    %c0_1 = arith.constant 0 : index
    %c0_2 = arith.constant 0 : index
    %1 = vector.load %arg2[%c0_1, %c0_2] : memref<4x1xi32, #tpu.memory_space<vmem>>, vector<4x1xi32>
    %cst = arith.constant dense<0xFF800000> : vector<4xf32>
    %2 = vector.multi_reduction <maximumf>, %0, %cst [1] : vector<4x8xf32> to vector<4xf32>
    %3 = vector.shape_cast %2 : vector<4xf32> to vector<4x1xf32>
    %4 = vector.broadcast %3 : vector<4x1xf32> to vector<4x8xf32>
    %5 = arith.subf %0, %4 : vector<4x8xf32>
    %6 = math.exp %5 : vector<4x8xf32>
    %cst_3 = arith.constant dense<0.000000e+00> : vector<4xf32>
    %7 = vector.multi_reduction <add>, %6, %cst_3 [1] : vector<4x8xf32> to vector<4xf32>
    %8 = vector.shape_cast %7 : vector<4xf32> to vector<4x1xf32>
    %9 = math.log %8 : vector<4x1xf32>
    %10 = tpu.iota {dimensions = array<i32: 1>} : vector<4x8xi32>
    %11 = vector.broadcast %1 : vector<4x1xi32> to vector<4x8xi32>
    %12 = arith.cmpi eq, %10, %11 : vector<4x8xi32>
    %cst_4 = arith.constant 0.000000e+00 : f32
    %13 = vector.broadcast %cst_4 : f32 to vector<4x8xf32>
    %14 = arith.select %12, %5, %13 : vector<4x8xi1>, vector<4x8xf32>
    %cst_5 = arith.constant dense<0.000000e+00> : vector<4xf32>
    %15 = vector.multi_reduction <add>, %14, %cst_5 [1] : vector<4x8xf32> to vector<4xf32>
    %16 = vector.shape_cast %15 : vector<4xf32> to vector<4x1xf32>
    %17 = arith.subf %9, %16 : vector<4x1xf32>
    %cst_6 = arith.constant dense<0.000000e+00> : vector<1xf32>
    %18 = vector.multi_reduction <add>, %17, %cst_6 [0] : vector<4x1xf32> to vector<1xf32>
    %19 = vector.shape_cast %18 : vector<1xf32> to vector<1x1xf32>
    %cst_7 = arith.constant 4.000000e+00 : f32
    %20 = vector.broadcast %cst_7 : f32 to vector<1x1xf32>
    %21 = arith.divf %19, %20 : vector<1x1xf32>
    %c0_8 = arith.constant 0 : index
    %c0_9 = arith.constant 0 : index
    %22 = vector.load %arg3[%c0_8, %c0_9] : memref<6x8xf32, #tpu.memory_space<vmem>>, vector<6x8xf32>
    %c0_10 = arith.constant 0 : index
    %c0_11 = arith.constant 0 : index
    %23 = vector.load %arg4[%c0_10, %c0_11] : memref<6x1xi32, #tpu.memory_space<vmem>>, vector<6x1xi32>
    %cst_12 = arith.constant dense<0xFF800000> : vector<6xf32>
    %24 = vector.multi_reduction <maximumf>, %22, %cst_12 [1] : vector<6x8xf32> to vector<6xf32>
    %25 = vector.shape_cast %24 : vector<6xf32> to vector<6x1xf32>
    %26 = vector.broadcast %25 : vector<6x1xf32> to vector<6x8xf32>
    %27 = arith.subf %22, %26 : vector<6x8xf32>
    %28 = math.exp %27 : vector<6x8xf32>
    %cst_13 = arith.constant dense<0.000000e+00> : vector<6xf32>
    %29 = vector.multi_reduction <add>, %28, %cst_13 [1] : vector<6x8xf32> to vector<6xf32>
    %30 = vector.shape_cast %29 : vector<6xf32> to vector<6x1xf32>
    %31 = math.log %30 : vector<6x1xf32>
    %32 = tpu.iota {dimensions = array<i32: 1>} : vector<6x8xi32>
    %33 = vector.broadcast %23 : vector<6x1xi32> to vector<6x8xi32>
    %34 = arith.cmpi eq, %32, %33 : vector<6x8xi32>
    %cst_14 = arith.constant 0.000000e+00 : f32
    %35 = vector.broadcast %cst_14 : f32 to vector<6x8xf32>
    %36 = arith.select %34, %27, %35 : vector<6x8xi1>, vector<6x8xf32>
    %cst_15 = arith.constant dense<0.000000e+00> : vector<6xf32>
    %37 = vector.multi_reduction <add>, %36, %cst_15 [1] : vector<6x8xf32> to vector<6xf32>
    %38 = vector.shape_cast %37 : vector<6xf32> to vector<6x1xf32>
    %39 = arith.subf %31, %38 : vector<6x1xf32>
    %cst_16 = arith.constant dense<0.000000e+00> : vector<1xf32>
    %40 = vector.multi_reduction <add>, %39, %cst_16 [0] : vector<6x1xf32> to vector<1xf32>
    %41 = vector.shape_cast %40 : vector<1xf32> to vector<1x1xf32>
    %cst_17 = arith.constant 6.000000e+00 : f32
    %42 = vector.broadcast %cst_17 : f32 to vector<1x1xf32>
    %43 = arith.divf %41, %42 : vector<1x1xf32>
    %c0_18 = arith.constant 0 : index
    %c0_19 = arith.constant 0 : index
    %44 = vector.load %arg5[%c0_18, %c0_19] : memref<2x4xf32, #tpu.memory_space<vmem>>, vector<2x4xf32>
    %c0_20 = arith.constant 0 : index
    %c0_21 = arith.constant 0 : index
    %45 = vector.load %arg6[%c0_20, %c0_21] : memref<2x1xi32, #tpu.memory_space<vmem>>, vector<2x1xi32>
    %cst_22 = arith.constant dense<0xFF800000> : vector<2xf32>
    %46 = vector.multi_reduction <maximumf>, %44, %cst_22 [1] : vector<2x4xf32> to vector<2xf32>
    %47 = vector.shape_cast %46 : vector<2xf32> to vector<2x1xf32>
    %48 = vector.broadcast %47 : vector<2x1xf32> to vector<2x4xf32>
    %49 = arith.subf %44, %48 : vector<2x4xf32>
    %50 = math.exp %49 : vector<2x4xf32>
    %cst_23 = arith.constant dense<0.000000e+00> : vector<2xf32>
    %51 = vector.multi_reduction <add>, %50, %cst_23 [1] : vector<2x4xf32> to vector<2xf32>
    %52 = vector.shape_cast %51 : vector<2xf32> to vector<2x1xf32>
    %53 = math.log %52 : vector<2x1xf32>
    %54 = tpu.iota {dimensions = array<i32: 1>} : vector<2x4xi32>
    %55 = vector.broadcast %45 : vector<2x1xi32> to vector<2x4xi32>
    %56 = arith.cmpi eq, %54, %55 : vector<2x4xi32>
    %cst_24 = arith.constant 0.000000e+00 : f32
    %57 = vector.broadcast %cst_24 : f32 to vector<2x4xf32>
    %58 = arith.select %56, %49, %57 : vector<2x4xi1>, vector<2x4xf32>
    %cst_25 = arith.constant dense<0.000000e+00> : vector<2xf32>
    %59 = vector.multi_reduction <add>, %58, %cst_25 [1] : vector<2x4xf32> to vector<2xf32>
    %60 = vector.shape_cast %59 : vector<2xf32> to vector<2x1xf32>
    %61 = arith.subf %53, %60 : vector<2x1xf32>
    %cst_26 = arith.constant dense<0.000000e+00> : vector<1xf32>
    %62 = vector.multi_reduction <add>, %61, %cst_26 [0] : vector<2x1xf32> to vector<1xf32>
    %63 = vector.shape_cast %62 : vector<1xf32> to vector<1x1xf32>
    %cst_27 = arith.constant 2.000000e+00 : f32
    %64 = vector.broadcast %cst_27 : f32 to vector<1x1xf32>
    %65 = arith.divf %63, %64 : vector<1x1xf32>
    %c0_28 = arith.constant 0 : index
    %c0_29 = arith.constant 0 : index
    %66 = vector.load %arg7[%c0_28, %c0_29] : memref<4x32xf32, #tpu.memory_space<vmem>>, vector<4x32xf32>
    %c0_30 = arith.constant 0 : index
    %c0_31 = arith.constant 0 : index
    %67 = vector.load %arg8[%c0_30, %c0_31] : memref<4x32xf32, #tpu.memory_space<vmem>>, vector<4x32xf32>
    %68 = arith.subf %66, %67 : vector<4x32xf32>
    %69 = arith.mulf %68, %68 : vector<4x32xf32>
    %cst_32 = arith.constant dense<0.000000e+00> : vector<4xf32>
    %70 = vector.multi_reduction <add>, %69, %cst_32 [1] : vector<4x32xf32> to vector<4xf32>
    %71 = vector.shape_cast %70 : vector<4xf32> to vector<4x1xf32>
    %cst_33 = arith.constant dense<0.000000e+00> : vector<1xf32>
    %72 = vector.multi_reduction <add>, %71, %cst_33 [0] : vector<4x1xf32> to vector<1xf32>
    %73 = vector.shape_cast %72 : vector<1xf32> to vector<1x1xf32>
    %cst_34 = arith.constant 1.280000e+02 : f32
    %74 = vector.broadcast %cst_34 : f32 to vector<1x1xf32>
    %75 = arith.divf %73, %74 : vector<1x1xf32>
    %76 = tpu.iota {dimensions = array<i32: 1>} : vector<1x4xi32>
    %c0_i32 = arith.constant 0 : i32
    %77 = vector.broadcast %c0_i32 : i32 to vector<1x4xi32>
    %78 = arith.cmpi eq, %76, %77 : vector<1x4xi32>
    %cst_35 = arith.constant 0.000000e+00 : f32
    %79 = vector.shape_cast %21 : vector<1x1xf32> to vector<1x1xf32>
    %80 = vector.broadcast %79 : vector<1x1xf32> to vector<1x4xf32>
    %81 = vector.broadcast %cst_35 : f32 to vector<1x4xf32>
    %82 = arith.select %78, %80, %81 : vector<1x4xi1>, vector<1x4xf32>
    %c1_i32 = arith.constant 1 : i32
    %83 = vector.broadcast %c1_i32 : i32 to vector<1x4xi32>
    %84 = arith.cmpi eq, %76, %83 : vector<1x4xi32>
    %cst_36 = arith.constant 0.000000e+00 : f32
    %85 = vector.shape_cast %75 : vector<1x1xf32> to vector<1x1xf32>
    %86 = vector.broadcast %85 : vector<1x1xf32> to vector<1x4xf32>
    %87 = vector.broadcast %cst_36 : f32 to vector<1x4xf32>
    %88 = arith.select %84, %86, %87 : vector<1x4xi1>, vector<1x4xf32>
    %89 = arith.addf %82, %88 : vector<1x4xf32>
    %c2_i32 = arith.constant 2 : i32
    %90 = vector.broadcast %c2_i32 : i32 to vector<1x4xi32>
    %91 = arith.cmpi eq, %76, %90 : vector<1x4xi32>
    %cst_37 = arith.constant 0.000000e+00 : f32
    %92 = vector.shape_cast %43 : vector<1x1xf32> to vector<1x1xf32>
    %93 = vector.broadcast %92 : vector<1x1xf32> to vector<1x4xf32>
    %94 = vector.broadcast %cst_37 : f32 to vector<1x4xf32>
    %95 = arith.select %91, %93, %94 : vector<1x4xi1>, vector<1x4xf32>
    %96 = arith.addf %89, %95 : vector<1x4xf32>
    %c3_i32 = arith.constant 3 : i32
    %97 = vector.broadcast %c3_i32 : i32 to vector<1x4xi32>
    %98 = arith.cmpi eq, %76, %97 : vector<1x4xi32>
    %cst_38 = arith.constant 0.000000e+00 : f32
    %99 = vector.shape_cast %65 : vector<1x1xf32> to vector<1x1xf32>
    %100 = vector.broadcast %99 : vector<1x1xf32> to vector<1x4xf32>
    %101 = vector.broadcast %cst_38 : f32 to vector<1x4xf32>
    %102 = arith.select %98, %100, %101 : vector<1x4xi1>, vector<1x4xf32>
    %103 = arith.addf %96, %102 : vector<1x4xf32>
    %c0_39 = arith.constant 0 : index
    %c0_40 = arith.constant 0 : index
    %104 = vector.load %arg9[%c0_39, %c0_40] : memref<1x4xf32, #tpu.memory_space<vmem>>, vector<1x4xf32>
    tpu.vector_store %arg9[%c0_39, %c0_40], %103 {strides = array<i32>} : memref<1x4xf32, #tpu.memory_space<vmem>>, vector<1x4xf32>,
    return
  }
  func.func @transform_0(%arg0: i32) -> (i32, i32) {
    %c0_i32 = arith.constant 0 : i32
    %c0_i32_0 = arith.constant 0 : i32
    %c0_i32_1 = arith.constant 0 : i32
    return %c0_i32, %c0_i32_0 : i32, i32
  }
  func.func @transform_1(%arg0: i32) -> (i32, i32) {
    %c0_i32 = arith.constant 0 : i32
    %c0_i32_0 = arith.constant 0 : i32
    %c0_i32_1 = arith.constant 0 : i32
    return %c0_i32, %c0_i32_0 : i32, i32
  }
  func.func @transform_2(%arg0: i32) -> (i32, i32) {
    %c0_i32 = arith.constant 0 : i32
    %c0_i32_0 = arith.constant 0 : i32
    %c0_i32_1 = arith.constant 0 : i32
    return %c0_i32, %c0_i32_0 : i32, i32
  }
  func.func @transform_3(%arg0: i32) -> (i32, i32) {
    %c0_i32 = arith.constant 0 : i32
    %c0_i32_0 = arith.constant 0 : i32
    %c0_i32_1 = arith.constant 0 : i32
    return %c0_i32, %c0_i32_0 : i32, i32
  }
  func.func @transform_4(%arg0: i32) -> (i32, i32) {
    %c0_i32 = arith.constant 0 : i32
    %c0_i32_0 = arith.constant 0 : i32
    %c0_i32_1 = arith.constant 0 : i32
    return %c0_i32, %c0_i32_0 : i32, i32
  }
  func.func @transform_5(%arg0: i32) -> (i32, i32) {
    %c0_i32 = arith.constant 0 : i32
    %c0_i32_0 = arith.constant 0 : i32
    %c0_i32_1 = arith.constant 0 : i32
    return %c0_i32, %c0_i32_0 : i32, i32
  }
  func.func @transform_6(%arg0: i32) -> (i32, i32) {
    %c0_i32 = arith.constant 0 : i32
    %c0_i32_0 = arith.constant 0 : i32
    %c0_i32_1 = arith.constant 0 : i32
    return %c0_i32, %c0_i32_0 : i32, i32
  }
  func.func @transform_7(%arg0: i32) -> (i32, i32) {
    %c0_i32 = arith.constant 0 : i32
    %c0_i32_0 = arith.constant 0 : i32
    %c0_i32_1 = arith.constant 0 : i32
    return %c0_i32, %c0_i32_0 : i32, i32
  }
  func.func @transform_8(%arg0: i32) -> (i32, i32) {
    %c0_i32 = arith.constant 0 : i32
    %c0_i32_0 = arith.constant 0 : i32
    %c0_i32_1 = arith.constant 0 : i32
    return %c0_i32, %c0_i32_0 : i32, i32
  }
}

</mosaic_0001>

<bundles_post_ra>
// kernel: forward.3
= control target key start
LH: loop header
LB: loop body
LE: loop exit
PB: predicated region body
PF: predicated region fallthrough
CT: control target
= control target key end

     0   :  { %vm99_vm0 = vcmask 25600   ;;  %vm31_vm1 = vcmask 60416   ;;  %vm66_vm2 = vcmask 62464   ;;  %v179_v3 = vmov 0   ;;  %s270_s4 = inlined_call_operand.vmem [shape: f32[2,4], index: 4, kind: input, shape index: {}]   ;;  %s271_s0 = inlined_call_operand.vmem [shape: f32[4,8], index: 0, kind: input, shape index: {}]   ;;  %s272_s2 = inlined_call_operand.vmem [shape: f32[6,8], index: 2, kind: input, shape index: {}]   ;;  %s273_s1 = inlined_call_operand.vmem [shape: s32[4,1], index: 1, kind: input, shape index: {}]   ;;  %s274_s5 = inlined_call_operand.vmem [shape: s32[2,1], index: 5, kind: input, shape index: {}]   ;;  %s275_s3 = inlined_call_operand.vmem [shape: s32[6,1], index: 3, kind: input, shape index: {}]   ;;  %s276_s6 = inlined_call_operand.vmem [shape: f32[4,32], index: 6, kind: input, shape index: {}]   ;;  %s277_s7 = inlined_call_operand.vmem [shape: f32[4,32], index: 7, kind: input, shape index: {}]   ;;  %s278_s8 = inlined_call_operand.vmem [shape: f32[1,4], index: 8, kind: output, shape index: {}]  }
   0x1   :  { %v97_v0 = vld [vmem:[%s270_s4] sm:$0x3]  ;;  %165 = vset.pattern.permute.xlu1 %v179_v3  ;;  %166 = vset.pattern.permute.xlu0 %v179_v3  ;;  %v43_v19 = vlaneseq  ;;  %vm134_vm5 = vcmask 257024   ;;  %vm54_vm7 = vcmask 1043456   ;;  %vm87_vm8 = vcmask 1045504  }
   0x2   :  { %v29_v1 = vld [vmem:[%s271_s0] sm:$0xf]  ;;  %v100_v4 = vsel %vm99_vm0, %v97_v0, -inf  ;;  %vm120_vm9 = vcmask 1041408   ;;  %vm158_vm14 = vcmask 24576  }
   0x3   :  { %v64_v2 = vld [vmem:[%s272_s2] sm:$0x3f]  ;;  %v32_v5 = vsel %vm31_vm1, %v29_v1, -inf  ;;  %101 = vmax.xlane.f32.xlu1 %v100_v4  ;;  %v246_v21 = vand.u32 127, %v43_v19 }
   0x4   :  { %33 = vmax.xlane.f32.xlu0 %v32_v5  ;;  %v67_v6 = vsel %vm66_vm2, %v64_v2, -inf  ;;  %v30_v7 = vld [vmem:[%s273_s1] sm:$0xf] }
   0x5   :  { %v98_v8 = vld [vmem:[%s274_s5] sm:$0x3]  ;;  %vm147_vm10 = vcmp.eq.s32.totalorder %v246_v21, 0  ;;  %vm149_vm11 = vcmp.eq.s32.totalorder %v246_v21, 1  ;;  %vm152_vm12 = vcmp.eq.s32.totalorder %v246_v21, 2  ;;  %vm155_vm13 = vcmp.eq.s32.totalorder %v246_v21, 3 }
   0x6   :  { %v65_v9 = vld [vmem:[%s275_s3] sm:$0x3f] }
   0x7   :  { %v130_v29 = vld [vmem:[%s276_s6] sm:$0xf] }
   0x8   :  { %68 = vmax.xlane.f32.xlu0 %v67_v6  ;;  %v131_v30 = vld [vmem:[%s277_s7] sm:$0xf] }
   0x9   :  { %v132_v32 = vsub.f32 %v130_v29, %v131_v30 }
   0xb   :  { %v133_v35 = vmul.f32 %v132_v32, %v132_v32 }
   0xd   :  { %v135_v38 = vsel %vm134_vm5, %v133_v35, 0.0 }
  0x14   :  { %46 = vperm.xlu1 %165, %v30_v7  }
  0x18   :  { %112 = vperm.xlu1 %165, %v98_v8  }
  0x1e   :  { %79 = vperm.xlu0 %166, %v65_v9  }
  0x90   :  { %v102_v10 = vpop.xlane.xlu1 %101 }
  0x91   :  { %v34_v11 = vpop.xlane.xlu0 %33  ;;  %v103_v12 = vsub.f32 %v97_v0, %v102_v10 }
  0x92   :  { %v35_v13 = vsub.f32 %v29_v1, %v34_v11 }
  0x93   :  { %v104_v14 = vmul.f32 1.442695, %v103_v12 }
  0x94   :  { %v36_v15 = vmul.f32 1.442695, %v35_v13  ;;  %v47_v23 = vpop.permute.xlu1 %46 }
  0x95   :  { %v69_v16 = vpop.xlane.xlu0 %68  ;;  %167 = vpow2.f32 %v104_v14  ;;  %vm48_vm3 = vcmp.eq.s32.totalorder %v246_v21, %v47_v23 }
  0x96   :  { %v70_v17 = vsub.f32 %v64_v2, %v69_v16  ;;  %169 = vpow2.f32 %v36_v15  ;;  %v49_v31 = vsel %vm48_vm3, %v35_v13, 0.0 }
  0x97   :  { %v50_v33 = vsel %vm31_vm1, %v49_v31, 0.0 }
  0x98   :  { %v71_v18 = vmul.f32 1.442695, %v70_v17  ;;  %v113_v36 = vpop.permute.xlu1 %112 }
  0x99   :  { %vm114_vm6 = vcmp.eq.s32.totalorder %v246_v21, %v113_v36 }
  0x9a   :  { %171 = vpow2.f32 %v71_v18  ;;  %v115_v39 = vsel %vm114_vm6, %v103_v12, 0.0 }
  0x9b   :  { %v116_v40 = vsel %vm99_vm0, %v115_v39, 0.0 }
  0x9d   :  { %v80_v27 = vpop.permute.xlu0 %79 }
  0x9e   :  { %vm81_vm4 = vcmp.eq.s32.totalorder %v246_v21, %v80_v27 }
  0x9f   :  { %v168_v20 = vpop.eup %167  ;;  %v82_v34 = vsel %vm81_vm4, %v70_v17, 0.0 }
  0xa0   :  { %v170_v22 = vpop.eup %169  ;;  %v106_v26 = vsel %vm99_vm0, %v168_v20, 0.0  ;;  %v83_v37 = vsel %vm66_vm2, %v82_v34, 0.0 }
  0xa1   :  { %v38_v24 = vsel %vm31_vm1, %v170_v22, 0.0 }
  0xa2   :  { %39 = vadd.xlane.f32.xlu1 %v38_v24 }
  0xa4   :  { %v172_v25 = vpop.eup %171 }
  0xa5   :  { %v73_v28 = vsel %vm66_vm2, %v172_v25, 0.0 }
  0xa6   :  { %74 = vadd.xlane.f32.xlu0 %v73_v28  ;;  %107 = vadd.xlane.f32.xlu1 %v106_v26 }
  0xaa   :  { %51 = vadd.xlane.f32.xlu1 %v50_v33 }
  0xae   :  { %84 = vadd.xlane.f32.xlu1 %v83_v37 }
  0xb2   :  { %136 = vadd.xlane.f32.xlu1 %v135_v38 }
  0xb6   :  { %117 = vadd.xlane.f32.xlu1 %v116_v40 }
 0x12f   :  { %v40_v41 = vpop.xlane.xlu1 %39 }
 0x130   :  { %173 = vlog2.f32 %v40_v41 }
 0x133   :  { %v75_v42 = vpop.xlane.xlu0 %74  ;;  %v108_v43 = vpop.xlane.xlu1 %107 }
 0x134   :  { %175 = vlog2.f32 %v75_v42 }
 0x135   :  { %177 = vlog2.f32 %v108_v43 }
 0x137   :  { %v52_v44 = vpop.xlane.xlu1 %51 }
 0x13a   :  { %v174_v45 = vpop.eup %173 }
 0x13b   :  { %v42_v46 = vmul.f32 0.6931472, %v174_v45  ;;  %v85_v47 = vpop.xlane.xlu1 %84 }
 0x13d   :  { %v53_v49 = vsub.f32 %v42_v46, %v52_v44 }
 0x13e   :  { %v176_v48 = vpop.eup %175 }
 0x13f   :  { %v77_v50 = vmul.f32 0.6931472, %v176_v48  ;;  %v178_v51 = vpop.eup %177  ;;  %v55_v52 = vsel %vm54_vm7, %v53_v49, 0.0  ;;  %v137_v53 = vpop.xlane.xlu1 %136 }
 0x140   :  { %v56_v55 = vrot.slane %v55_v52, 4  ;;  %v138_v56 = vsel %vm54_vm7, %v137_v53, 0.0  ;;  %v110_v60 = vmul.f32 0.6931472, %v178_v51 }
 0x141   :  { %v86_v54 = vsub.f32 %v77_v50, %v85_v47  ;;  %v139_v57 = vrot.slane %v138_v56, 4 }
 0x142   :  { %v57_v59 = vadd.f32 %v56_v55, %v55_v52 }
 0x143   :  { %v88_v58 = vsel %vm87_vm8, %v86_v54, 0.0  ;;  %v140_v62 = vadd.f32 %v139_v57, %v138_v56  ;;  %v118_v63 = vpop.xlane.xlu1 %117 }
 0x144   :  { %v89_v61 = vrot.slane %v88_v58, 4  ;;  %v58_v0 = vrot.slane %v57_v59, 2  ;;  %v119_v1 = vsub.f32 %v110_v60, %v118_v63 }
 0x145   :  { %v141_v3 = vrot.slane %v140_v62, 2 }
 0x146   :  { %v90_v2 = vadd.f32 %v89_v61, %v88_v58  ;;  %v59_v4 = vadd.f32 %v58_v0, %v57_v59  ;;  %v121_v5 = vsel %vm120_vm9, %v119_v1, 0.0 }
 0x147   :  { %v142_v7 = vadd.f32 %v141_v3, %v140_v62  ;;  %v122_v8 = vrot.slane %v121_v5, 4 }
 0x148   :  { %v91_v6 = vrot.slane %v90_v2, 2  ;;  %v60_v9 = vrot.slane %v59_v4, 1 }
 0x149   :  { %v143_v11 = vrot.slane %v142_v7, 1  ;;  %v123_v12 = vadd.f32 %v122_v8, %v121_v5 }
 0x14a   :  { %v92_v10 = vadd.f32 %v91_v6, %v90_v2  ;;  %v61_v13 = vadd.f32 %v60_v9, %v59_v4 }
 0x14b   :  { %v144_v15 = vadd.f32 %v143_v11, %v142_v7  ;;  %v124_v16 = vrot.slane %v123_v12, 2 }
 0x14c   :  { %v93_v14 = vrot.slane %v92_v10, 1  ;;  %v63_v17 = vmul.f32 0.25, %v61_v13 }
 0x14d   :  { %v146_v19 = vmul.f32 0.0078125, %v144_v15  ;;  %v125_v20 = vadd.f32 %v124_v16, %v123_v12 }
 0x14e   :  { %v94_v18 = vadd.f32 %v93_v14, %v92_v10  ;;  %v148_v22 = vsel %vm147_vm10, %v63_v17, 0.0 }
 0x14f   :  { %v150_v24 = vsel %vm149_vm11, %v146_v19, 0.0  ;;  %v126_v25 = vrot.slane %v125_v20, 1 }
 0x150   :  { %v96_v23 = vmul.f32 0.16666667, %v94_v18  ;;  %v151_v26 = vadd.f32 %v150_v24, %v148_v22 }
 0x151   :  { %v127_v28 = vadd.f32 %v126_v25, %v125_v20 }
 0x152   :  { %v153_v27 = vsel %vm152_vm12, %v96_v23, 0.0 }
 0x153   :  { %v154_v29 = vadd.f32 %v153_v27, %v151_v26  ;;  %v129_v30 = vmul.f32 0.5, %v127_v28 }
 0x155   :  { %v156_v31 = vsel %vm155_vm13, %v129_v30, 0.0 }
 0x156   :  { %v157_v32 = vadd.f32 %v156_v31, %v154_v29 }
 0x158   :  { %159 = vst.msk [vmem:[%s278_s8] sm:$0x1] %vm158_vm14, %v157_v32 }

// kernel: forward.2
= control target key start
LH: loop header
LB: loop body
LE: loop exit
PB: predicated region body
PF: predicated region fallthrough
CT: control target
= control target key end

     0   :  { %s2010_s3 = smov 4   ;;  %v2011_v0 = vmov 0.0   ;;  %s2012_s7 = smov 1   ;;  %vm158_vm0 = vcmask 523264   ;;  %vm2014_vm1 = vmmov 0   ;;  %v2015_v12 = vmov 0.0|0.0   ;;  %s2248_s0 = inlined_call_operand.smem [shape: u32[31], index: -1, kind: input, shape index: {}] }
   0x1   :  { %s1634_s6 = sld [smem:[%s2248_s0 + %s2010_s3]]   ;;  %1778 = vmatprep.subr.bf16.mxu0 %v2011_v0  ;;  %s2013_s11 = smov 2   ;;  %1786 = vmatprep.mubr.msk.bf16.mxu0 %vm2014_vm1, %v2011_v0  ;;  %vm310_vm2 = vcmask 261120   ;;  %vm613_vm3 = vcmask 58368   ;;  %vm908_vm4 = vcmask 1041408   ;;  %vm954_vm5 = vcmask 15360  }
   0x2   :  { %s1631_s10 = sld [smem:[%s2248_s0 + %s2012_s7]]   ;;  %s2016_s18 = smov 10   ;;  %vm889_vm6 = vcmask 25600   ;;  %vm904_vm7 = vcmask 31744   ;;  %vm1252_vm8 = vcmask 64512   ;;  %vm1605_vm9 = vcmask 62464  }
   0x3   :  { %s1632_s14 = sld [smem:[%s2248_s0 + %s2013_s11]]   ;;  %s2017_s22 = smov 5  }
   0x4   :  { %s1_s17 = sld [smem:[%s2248_s0]]   ;;  %s2018_s26 = smov 30  }
   0x5   :  { %s2076_s21 = sld [smem:[%s2248_s0 + %s2016_s18]]   ;;  %s2019_s30 = smov 6  }
   0x6   :  { %s1635_s25 = sld [smem:[%s2248_s0 + %s2017_s22]]   ;;  %s2020_s4 = smov 7  }
   0x7   :  { %v1984_v1 = vld [vmem:[%s1634_s6] sm:$0xff]   ;;  %v1985_v2 = vld [vmem:[%s1634_s6 + $0x8] sm:$0xff]   ;;  %v1986_v3 = vld [vmem:[%s1634_s6 + $0x10] sm:$0xff]   ;;  %s1660_s29 = sld [smem:[%s2248_s0 + %s2018_s26]]   ;;  %s2021_s8 = smov 8  }
   0x8   :  { %1790 = vmatprep.subr.bf16.mxu1 %v1984_v1  ;;  %v1988_v4 = vld [vmem:[%s1631_s10] sm:$0xff]   ;;  %v1987_v6 = vld [vmem:[%s1634_s6 + $0x18] sm:$0xff]   ;;  %v1989_v9 = vld [vmem:[%s1631_s10 + $0x8] sm:$0xff]   ;;  %s1636_s3 = sld [smem:[%s2248_s0 + %s2019_s30]]   ;;  %s2022_s12 = smov 3  }
   0x9   :  { %1791 = vmatpush3.bf16.msra.mxu1 %v1984_v1  ;;  %1798 = vmatprep.mubr.msk.bf16.mxu1 %vm158_vm0, %v1988_v4  ;;  %v1990_v5 = vld [vmem:[%s1632_s14] sm:$0xff]   ;;  %v1991_v7 = vld [vmem:[%s1632_s14 + $0x8] sm:$0xff]   ;;  %v1992_v8 = vld [vmem:[%s1632_s14 + $0x10] sm:$0xff]   ;;  %s1637_s7 = sld [smem:[%s2248_s0 + %s2020_s4]]   ;;  %s2023_s16 = smov 9  }
   0xa   :  { %1792 = vmatprep.subr.bf16.mxu1 %v1985_v2  ;;  %1779 = vmatpush3.bf16.msra.mxu0 %v1990_v5  ;;  %v1993_v10 = vld [vmem:[%s1632_s14 + $0x18] sm:$0xff]   ;;  %v118_v11 = vld [vmem:[%s1_s17] sm:$0x3]  ;;  %s1638_s11 = sld [smem:[%s2248_s0 + %s2021_s8]]   ;;  %s2024_s20 = smov 12  }
   0xb   :  { %1780 = vmatprep.subr.bf16.mxu0 %v2011_v0  ;;  %v1994_v27 = vld [vmem:[%s2076_s21] sm:$0xff]   ;;  %v1995_v28 = vld [vmem:[%s2076_s21 + $0x8] sm:$0xff]   ;;  %s1633_s15 = sld [smem:[%s2248_s0 + %s2022_s12]]   ;;  %s2025_s24 = smov 25  }
   0xc   :  { %v1667_v13 = vld [vmem:[%s1635_s25] ss:$0 sm:$0xff]  ;;  %s1639_s19 = sld [smem:[%s2248_s0 + %s2023_s16]]   ;;  %s2026_s28 = smov 26  }
   0xd   :  { %1793 = vmatpush3.bf16.msra.mxu1 %v1985_v2  ;;  %s1642_s23 = sld [smem:[%s2248_s0 + %s2024_s20]]   ;;  %s2027_s2 = smov 11  }
   0xe   :  { %1794 = vmatprep.subr.bf16.mxu1 %v1986_v3  ;;  %1781 = vmatpush3.bf16.msra.mxu0 %v1991_v7  ;;  %v315_v24 = vld [vmem:[%s1636_s3] sm:$0xff]  ;;  %s1655_s27 = sld [smem:[%s2248_s0 + %s2025_s24]]   ;;  %s2028_s6 = smov 16  }
   0xf   :  { %1782 = vmatprep.subr.bf16.mxu0 %v2011_v0  ;;  %v389_v25 = vld [vmem:[%s1637_s7] sm:$0xff]  ;;  %s1656_s1 = sld [smem:[%s2248_s0 + %s2026_s28]]   ;;  %s2029_s10 = smov 13  }
  0x10   :  { %v463_v26 = vld [vmem:[%s1638_s11] sm:$0xff]  ;;  %s1641_s5 = sld [smem:[%s2248_s0 + %s2027_s2]]   ;;  %s2030_s14 = smov 27  }
  0x11   :  { %1795 = vmatpush3.bf16.msra.mxu1 %v1986_v3  ;;  %v1661_v29 = vld [vmem:[%s1633_s15] ss:$0 sm:$0xff]  ;;  %s1646_s9 = sld [smem:[%s2248_s0 + %s2028_s6]]   ;;  %s2031_s18 = smov 14  }
  0x12   :  { %1796 = vmatprep.subr.bf16.mxu1 %v1987_v6  ;;  %1783 = vmatpush3.bf16.msra.mxu0 %v1992_v8  ;;  %v1996_v41 = vld [vmem:[%s1639_s19] sm:$0xff]   ;;  %v1997_v44 = vld [vmem:[%s1639_s19 + $0x8] sm:$0xff]   ;;  %s1643_s13 = sld [smem:[%s2248_s0 + %s2029_s10]]   ;;  %s2032_s22 = smov 15  }
  0x13   :  { %1784 = vmatprep.subr.bf16.mxu0 %v2011_v0  ;;  %v1998_v50 = vld [vmem:[%s1642_s23] sm:$0xff]   ;;  %v1999_v51 = vld [vmem:[%s1642_s23 + $0x8] sm:$0xff]   ;;  %s1657_s17 = sld [smem:[%s2248_s0 + %s2030_s14]]   ;;  %s2033_s26 = smov 18  }
  0x14   :  { %s1644_s21 = sld [smem:[%s2248_s0 + %s2031_s18]]   ;;  %s2034_s30 = smov 17  }
  0x15   :  { %1797 = vmatpush3.bf16.msra.mxu1 %v1987_v6  ;;  %s1645_s25 = sld [smem:[%s2248_s0 + %s2032_s22]]   ;;  %s2035_s4 = smov 23  }
  0x16   :  { %1785 = vmatpush3.bf16.msra.mxu0 %v1993_v10  ;;  %1935 = vmatprep.subr.bf16.mxu1 %v2015_v12  ;;  %v1689_v57 = vld [vmem:[%s1641_s5] ss:$0 sm:$0xff]  ;;  %s1647_s3 = sld [smem:[%s2248_s0 + %s2034_s30]]   ;;  %s2036_s8 = smov 19  }
  0x17   :  { %1929 = vmatprep.subr.bf16.mxu0 %v2015_v12  ;;  %v953_v2 = vld [vmem:[%s1646_s9] sm:$0xff]  ;;  %s1653_s7 = sld [smem:[%s2248_s0 + %s2035_s4]]   ;;  %s2037_s12 = smov 21  }
  0x18   :  { %1799 = vmatmul.mubr.msk.bf16.vlgmr.msra.gmra.mrb[0].mxu1 %vm158_vm0, %v1989_v9  ;;  %v1690_v3 = vld [vmem:[%s1643_s13] ss:$0 sm:$0xff]  ;;  %s1649_s11 = sld [smem:[%s2248_s0 + %s2036_s8]]   ;;  %s2038_s16 = smov 20  }
  0x19   :  { %1821 = vmatprep.mubr.msk.f32.mxu1 %vm2014_vm1, %v2011_v0  ;;  %1787 = vmatmul.mubr.msk.bf16.vlgmr.msra.gmra.mrb[0].mxu0 %vm158_vm0, %v118_v11  ;;  %s1651_s15 = sld [smem:[%s2248_s0 + %s2037_s12]]   ;;  %s2039_s20 = smov 28  }
  0x1a   :  { %1810 = vmatprep.mubr.msk.f32.mxu0 %vm2014_vm1, %v2011_v0  ;;  %s1650_s19 = sld [smem:[%s2248_s0 + %s2038_s16]]   ;;  %s2040_s24 = smov 22  }
  0x1b   :  { %s1658_s23 = sld [smem:[%s2248_s0 + %s2039_s20]]   ;;  %s2041_s28 = smov 24  }
  0x1c   :  { %s2042_s2 = smov 29  }
  0x1d   :  { %s1659_s5 = sld [smem:[%s2248_s0 + %s2042_s2]]  }
  0xeb   :  { %v1800_v14 = vpop.f32.mrb[0].mxu1 }
  0xec   :  { %v304_v15 = vadd.f32 %v1800_v14, %v1667_v13  ;;  %v295_v16 = vpop.f32.mrb[1].mxu1  ;;  %v196_v30 = vpop.f32.mrb[0].mxu0 }
  0xed   :  { %v296_v17 = vadd.f32 %v1667_v13, %v295_v16  ;;  %v1801_v18 = vpop.f32.mrb[2].mxu1  ;;  %v2115_v31 = vadd.f32 %v1661_v29, %v196_v30  ;;  %v1788_v32 = vpop.f32.mrb[1].mxu0 }
  0xee   :  { %313 = vst.msk [vmem:[%s1660_s29 + $0x10] sm:$0xff] %vm310_vm2, %v304_v15  ;;  %v307_v19 = vadd.f32 %v1801_v18, %v1667_v13  ;;  %v298_v20 = vpop.f32.mrb[3].mxu1  ;;  %v199_v33 = vpop.f32.mrb[2].mxu0  ;;  %v1701_v32 = vld [vmem:[%s1649_s11] ss:$0 sm:$0xff] }
  0xef   :  { %311 = vst.msk [vmem:[%s1660_s29] sm:$0xff] %vm310_vm2, %v296_v17  ;;  %v299_v21 = vadd.f32 %v1667_v13, %v298_v20  ;;  %v692_v34 = vpack.c.bf16 %v2115_v31, %v2115_v31  ;;  %v1789_v35 = vpop.f32.mrb[3].mxu0  ;;  %v615_v42 = vrot.slane %v2115_v31, 2 }
  0xf0   :  { %314 = vst.msk [vmem:[%s1660_s29 + $0x18] sm:$0xff] %vm310_vm2, %v307_v19  ;;  %v1933_v22 = vpack.c.bf16 %v307_v19, %v304_v15  ;;  %v903_v15 = vld [vmem:[%s1644_s21] sm:$0x3] }
  0xf1   :  { %312 = vst.msk [vmem:[%s1660_s29 + $0x8] sm:$0xff] %vm310_vm2, %v299_v21  ;;  %v1930_v23 = vpack.c.bf16 %v299_v21, %v296_v17  ;;  %v702_v36 = vrot.slane %v692_v34, 1  ;;  %v910_v16 = vsel %vm908_vm4, %v903_v15, 0  ;;  %v952_v17 = vld [vmem:[%s1645_s25] sm:$0xff]  ;;  %s1648_s29 = sld [smem:[%s2248_s0 + %s2033_s26]]  }
  0xf3   :  { %1931 = vmatpush3.bf16.msra.mxu0 %v1930_v23  ;;  %1937 = vmatpush3.bf16.msra.mxu1 %v1930_v23 }
  0xf4   :  { %1932 = vmatprep.subr.bf16.mxu0 %v2015_v12  ;;  %1938 = vmatprep.subr.bf16.mxu1 %v2015_v12 }
  0xf7   :  { %1934 = vmatpush3.bf16.msra.mxu0 %v1933_v22  ;;  %1940 = vmatpush3.bf16.msra.mxu1 %v1933_v22 }
  0xf8   :  { %1941 = vmatprep.subr.bf16.mxu0 %v2015_v12  ;;  %1835 = vmatprep.subr.mxu1 %v2011_v0 }
  0xfa   :  { %1811 = vmatmul.mubr.msk.f32.vlgmr.msra.gmra.mrb[4].mxu0 %vm310_vm2, %v315_v24  ;;  %1822 = vmatmul.mubr.msk.f32.vlgmr.msra.gmra.mrb[4].mxu1 %vm310_vm2, %v389_v25 }
  0xfb   :  { %1943 = vmatpush3.bf16.msra.mxu0 %v1930_v23  ;;  %1832 = vmatprep.mubr.msk.f32.mxu0 %vm2014_vm1, %v2011_v0  ;;  %v1105_v23 = vld [vmem:[%s1647_s3] sm:$0xff] }
  0xfc   :  { %1944 = vmatprep.subr.bf16.mxu0 %v2015_v12  ;;  %1837 = vmatprep.mubr.msk.f32.mxu1 %vm2014_vm1, %v2011_v0 }
  0xff   :  { %1946 = vmatpush3.bf16.msra.mxu0 %v1933_v22  ;;  %v2000_v22 = vld [vmem:[%s1648_s29] sm:$0xff]  }
 0x100   :  { %1845 = vmatprep.subr.bf16.mxu0 %v2011_v0 }
 0x102   :  { %1833 = vmatmul.mubr.msk.f32.vlgmr.msra.gmra.mrb[6].mxu0 %vm310_vm2, %v463_v26 }
 0x103   :  { %1846 = vmatpush3.bf16.msra.mxu0 %v1994_v27  ;;  %1849 = vmatprep.mubr.msk.bf16.mxu0 %vm2014_vm1, %v2011_v0 }
 0x104   :  { %1847 = vmatprep.subr.bf16.mxu0 %v2011_v0 }
 0x107   :  { %1848 = vmatpush3.bf16.msra.mxu0 %v1995_v28  ;;  %v2001_v28 = vld [vmem:[%s1648_s29 + $0x8] sm:$0xff]  }
 0x108   :  { %1861 = vmatprep.subr.bf16.mxu0 %v2011_v0 }
 0x10a   :  { %1850 = vmatmul.mubr.msk.bf16.vlgmr.msra.gmra.mrb[8].mxu0 %vm310_vm2, %v702_v36  ;;  %v1326_v36 = vld [vmem:[%s1651_s15] sm:$0x3f] }
 0x10b   :  { %1865 = vmatprep.mubr.msk.bf16.mxu0 %vm2014_vm1, %v2011_v0  ;;  %1862 = vmatpush3.bf16.msra.mxu0 %v1998_v50 }
 0x10c   :  { %1863 = vmatprep.subr.bf16.mxu0 %v2011_v0 }
 0x10f   :  { %1864 = vmatpush3.bf16.msra.mxu0 %v1999_v51 }
 0x110   :  { %1875 = vmatprep.subr.mxu0 %v2011_v0 }
 0x1cd   :  { %v385_v37 = vpop.f32.mrb[4].mxu0  ;;  %v459_v38 = vpop.f32.mrb[4].mxu1 }
 0x1ce   :  { %v1812_v39 = vpop.f32.mrb[5].mxu0  ;;  %1836 = vmatpush3.xpose.msk.msra.mxu1 %vm310_vm2, %v385_v37  ;;  %v1823_v40 = vpop.f32.mrb[5].mxu1  ;;  %v1251_v37 = vld [vmem:[%s1650_s19] sm:$0x3f] }
 0x1cf   :  { %1840 = vmatprep.subr.mxu1 %v2011_v0  ;;  %v2002_v39 = vld [vmem:[%s1653_s7] sm:$0xff]  }
 0x1d1   :  { %1838 = vmatmul.mubr.msk.f32.vlgmr.msra.gmra.mrb[6].mxu1 %vm310_vm2, %v2115_v31 }
 0x1d2   :  { %1841 = vmatpush3.xpose.msk.msra.mxu1 %vm310_vm2, %v459_v38  ;;  %1842 = vmatprep.mubr.msk.f32.mxu1 %vm2014_vm1, %v2011_v0 }
 0x1d3   :  { %1853 = vmatprep.subr.bf16.mxu1 %v2011_v0 }
 0x1d5   :  { %1843 = vmatmul.mubr.msk.f32.vlgmr.msra.gmra.mrb[8].mxu1 %vm310_vm2, %v615_v42  ;;  %v2135_v43 = vpop.f32.mrb[6].mxu0 }
 0x1d6   :  { %1854 = vmatpush3.bf16.msra.mxu1 %v1996_v41  ;;  %1857 = vmatprep.mubr.msk.bf16.mxu1 %vm2014_vm1, %v2011_v0  ;;  %v1834_v45 = vpop.f32.mrb[7].mxu0  ;;  %v2003_v41 = vld [vmem:[%s1653_s7 + $0x8] sm:$0xff]  }
 0x1d7   :  { %1855 = vmatprep.subr.bf16.mxu1 %v2011_v0 }
 0x1da   :  { %1856 = vmatpush3.bf16.msra.mxu1 %v1997_v44 }
 0x1db   :  { %1869 = vmatprep.subr.bf16.mxu1 %v2011_v0 }
 0x1dd   :  { %1858 = vmatmul.mubr.msk.bf16.vlgmr.msra.gmra.mrb[12].mxu1 %vm310_vm2, %v692_v34  ;;  %v752_v46 = vpop.f32.mrb[8].mxu0 }
 0x1de   :  { %1871 = vmatprep.mubr.msk.bf16.mxu1 %vm2014_vm1, %v2011_v0  ;;  %v1851_v47 = vpop.f32.mrb[9].mxu0  ;;  %1870 = vmatpush3.bf16.msra.mxu1 %v910_v16 }
 0x1df   :  { %v755_v48 = vpop.f32.mrb[10].mxu0  ;;  %1890 = vmatprep.subr.bf16.mxu1 %v2011_v0 }
 0x1e0   :  { %v1852_v49 = vpop.f32.mrb[11].mxu0 }
 0x2a4   :  { %v609_v52 = vpop.f32.mrb[6].mxu1 }
 0x2a5   :  { %614 = vst.msk [vmem:[%s1655_s27] sm:$0x3] %vm613_vm3, %v609_v52  ;;  %v1839_v53 = vpop.f32.mrb[7].mxu1  ;;  %s1652_s27 = sld [smem:[%s2248_s0 + %s2040_s24]]  }
 0x2a8   :  { %v687_v54 = vpop.f32.mrb[8].mxu1 }
 0x2a9   :  { %691 = vst.msk [vmem:[%s1656_s1] sm:$0x3] %vm613_vm3, %v687_v54  ;;  %v1844_v55 = vpop.f32.mrb[9].mxu1  ;;  %s1654_s1 = sld [smem:[%s2248_s0 + %s2041_s28]]  }
 0x2ab   :  { %v2005_v44 = vld [vmem:[%s1652_s27 + $0x8] sm:$0xff]  }
 0x2af   :  { %v1713_v53 = vld [vmem:[%s1654_s1] ss:$0 sm:$0xff] }
 0x2b0   :  { %v807_v56 = vpop.f32.mrb[12].mxu1 }
 0x2b1   :  { %v808_v58 = vadd.f32 %v807_v56, %v752_v46  ;;  %v1859_v59 = vpop.f32.mrb[13].mxu1 }
 0x2b2   :  { %v810_v60 = vpop.f32.mrb[14].mxu1 }
 0x2b3   :  { %v820_v61 = vadd.f32 %v1689_v57, %v808_v58  ;;  %v1860_v62 = vpop.f32.mrb[15].mxu1 }
 0x2b5   :  { %v821_v63 = vmax.f32 %v820_v61, 0.0 }
 0x2b7   :  { %v822_v1 = vpack.c.bf16 %v821_v63, %v821_v63 }
 0x2b9   :  { %1866 = vmatmul.mubr.msk.bf16.vlgmr.msra.gmra.mrb[12].mxu0 %vm310_vm2, %v822_v1 }
 0x2ba   :  { %1876 = vmatpush3.msk.msra.mxu0 %vm908_vm4, %v615_v42  ;;  %1877 = vmatprep.mubr.msk.f32.mxu0 %vm2014_vm1, %v2011_v0  ;;  %v2004_v42 = vld [vmem:[%s1652_s27] sm:$0xff]  }
 0x2bb   :  { %1880 = vmatprep.subr.mxu0 %v2011_v0 }
 0x2c1   :  { %1878 = vmatmul.mubr.msk.f32.vlgmr.msra.gmra.mrb[16].mxu0 %vm954_vm5, %v953_v2 }
 0x2c2   :  { %1881 = vmatpush3.msk.msra.mxu0 %vm908_vm4, %v2115_v31  ;;  %1882 = vmatprep.mubr.msk.f32.mxu0 %vm2014_vm1, %v2011_v0 }
 0x2c3   :  { %1885 = vmatprep.subr.mxu0 %v2011_v0 }
 0x2c9   :  { %1883 = vmatmul.mubr.msk.f32.vlgmr.msra.gmra.mrb[16].mxu0 %vm954_vm5, %v952_v17 }
 0x2ca   :  { %1887 = vmatprep.mubr.msk.f32.mxu0 %vm2014_vm1, %v2011_v0 }
 0x38c   :  { %v883_v4 = vpop.f32.mrb[12].mxu0 }
 0x38d   :  { %v884_v5 = vadd.f32 %v1690_v3, %v883_v4  ;;  %v1867_v6 = vpop.f32.mrb[13].mxu0 }
 0x38e   :  { %v886_v7 = vpop.f32.mrb[14].mxu0 }
 0x38f   :  { %v1868_v8 = vpop.f32.mrb[15].mxu0  ;;  %v891_v9 = vsel %vm889_vm6, %v884_v5, -inf  ;;  %890 = vst.msk [vmem:[%s1657_s17] sm:$0x3] %vm889_vm6, %v884_v5 }
 0x390   :  { %892 = vmax.xlane.f32.xlu0 %v891_v9 }
 0x41d   :  { %v893_v10 = vpop.xlane.xlu0 %892 }
 0x41e   :  { %v894_v11 = vsub.f32 %v884_v5, %v893_v10 }
 0x420   :  { %v895_v12 = vmul.f32 1.442695, %v894_v11 }
 0x422   :  { %2006 = vpow2.f32 %v895_v12 }
 0x42c   :  { %v2007_v13 = vpop.eup %2006 }
 0x42d   :  { %v897_v14 = vsel %vm889_vm6, %v2007_v13, 0.0 }
 0x42e   :  { %898 = vadd.xlane.f32.xlu0 %v897_v14 }
 0x4bb   :  { %v899_v18 = vpop.xlane.xlu0 %898 }
 0x4bc   :  { %2008 = vrcp.f32 %v899_v18 }
 0x4c6   :  { %v2009_v19 = vpop.eup %2008 }
 0x4c7   :  { %v901_v20 = vmul.f32 %v2009_v19, %v2007_v13 }
 0x4c9   :  { %v902_v21 = vpack.c.bf16 %v901_v20, %v901_v20 }
 0x4cb   :  { %1872 = vmatmul.mubr.msk.bf16.vlgmr.msra.gmra.mrb[16].mxu1 %vm904_vm7, %v902_v21 }
 0x4cc   :  { %1894 = vmatprep.mubr.msk.bf16.mxu1 %vm2014_vm1, %v2011_v0  ;;  %1891 = vmatpush3.bf16.msra.mxu1 %v2000_v22 }
 0x4cd   :  { %1892 = vmatprep.subr.bf16.mxu1 %v2011_v0 }
 0x4d0   :  { %1893 = vmatpush3.bf16.msra.mxu1 %v2001_v28 }
 0x4d1   :  { %1898 = vmatprep.subr.mxu1 %v2011_v0 }
 0x59e   :  { %v946_v24 = vpop.f32.mrb[16].mxu1 }
 0x59f   :  { %v1873_v25 = vpop.f32.mrb[17].mxu1  ;;  %1886 = vmatpush3.msk.msra.mxu0 %vm908_vm4, %v946_v24 }
 0x5a0   :  { %v949_v26 = vpop.f32.mrb[18].mxu1  ;;  %1888 = vmatmul.mubr.msk.f32.vlgmr.msra.gmra.mrb[16].mxu0 %vm954_vm5, %v1105_v23  ;;  %1903 = vmatprep.subr.mxu0 %v2011_v0 }
 0x5a1   :  { %v1874_v27 = vpop.f32.mrb[19].mxu1  ;;  %1905 = vmatprep.mubr.msk.f32.mxu0 %vm2014_vm1, %v2011_v0 }
 0x673   :  { %v1178_v29 = vpop.f32.mrb[16].mxu0 }
 0x674   :  { %v1183_v30 = vpack.c.bf16 %v1178_v29, %v1178_v29  ;;  %v1889_v31 = vpop.f32.mrb[17].mxu0 }
 0x676   :  { %1895 = vmatmul.mubr.msk.bf16.vlgmr.msra.gmra.mrb[20].mxu1 %vm310_vm2, %v1183_v30 }
 0x677   :  { %1900 = vmatprep.mubr.msk.f32.mxu1 %vm2014_vm1, %v2011_v0 }
 0x749   :  { %v1244_v33 = vpop.f32.mrb[20].mxu1 }
 0x74a   :  { %v1245_v34 = vadd.f32 %v1701_v32, %v1244_v33  ;;  %v1896_v35 = vpop.f32.mrb[21].mxu1 }
 0x74b   :  { %v1247_v38 = vpop.f32.mrb[22].mxu1 }
 0x74c   :  { %1250 = vst.msk [vmem:[%s1658_s23] sm:$0xff] %vm310_vm2, %v1245_v34  ;;  %v1897_v40 = vpop.f32.mrb[23].mxu1  ;;  %1899 = vmatpush3.msra.mxu1 %v1245_v34  ;;  %1904 = vmatpush3.msra.mxu0 %v1245_v34 }
 0x74d   :  { %1906 = vmatmul.mubr.msk.f32.vlgmr.msra.gmra.mrb[18].mxu0 %vm1252_vm8, %v1326_v36  ;;  %1901 = vmatmul.mubr.msk.f32.vlgmr.msra.gmra.mrb[10].mxu1 %vm1252_vm8, %v1251_v37 }
 0x74e   :  { %1908 = vmatprep.subr.bf16.mxu1 %v2011_v0  ;;  %1916 = vmatprep.subr.bf16.mxu0 %v2011_v0 }
 0x74f   :  { %1909 = vmatpush3.bf16.msra.mxu1 %v2002_v39  ;;  %1912 = vmatprep.mubr.msk.bf16.mxu1 %vm2014_vm1, %v2011_v0 }
 0x750   :  { %1910 = vmatprep.subr.bf16.mxu1 %v2011_v0  ;;  %1920 = vmatprep.mubr.msk.bf16.mxu0 %vm2014_vm1, %v2011_v0 }
 0x751   :  { %1917 = vmatpush3.bf16.msra.mxu0 %v2004_v42 }
 0x752   :  { %1918 = vmatprep.subr.bf16.mxu0 %v2011_v0 }
 0x753   :  { %1911 = vmatpush3.bf16.msra.mxu1 %v2003_v41 }
 0x754   :  { %1924 = vmatprep.subr.mxu1 %v2011_v0 }
 0x755   :  { %1919 = vmatpush3.bf16.msra.mxu0 %v2005_v44 }
 0x820   :  { %v1396_v45 = vpop.f32.mrb[18].mxu0  ;;  %v1322_v46 = vpop.f32.mrb[10].mxu1 }
 0x821   :  { %v1405_v47 = vpack.c.bf16 %v1396_v45, %v1396_v45  ;;  %v1400_v48 = vpack.c.bf16 %v1322_v46, %v1322_v46  ;;  %v1902_v49 = vpop.f32.mrb[11].mxu1  ;;  %v1907_v50 = vpop.f32.mrb[19].mxu0 }
 0x823   :  { %1913 = vmatmul.mubr.msk.bf16.vlgmr.msra.gmra.mrb[24].mxu1 %vm310_vm2, %v1405_v47  ;;  %1921 = vmatmul.mubr.msk.bf16.vlgmr.msra.gmra.mrb[20].mxu0 %vm310_vm2, %v1400_v48 }
 0x824   :  { %1925 = vmatpush3.xpose.msk.msra.mxu1 %vm310_vm2, %v2135_v43  ;;  %1926 = vmatprep.mubr.msk.f32.mxu1 %vm2014_vm1, %v2011_v0 }
 0x8f6   :  { %v1459_v51 = vpop.f32.mrb[24].mxu1  ;;  %v1514_v52 = vpop.f32.mrb[20].mxu0 }
 0x8f7   :  { %v1515_v54 = vadd.f32 %v1514_v52, %v1459_v51  ;;  %v1914_v55 = vpop.f32.mrb[25].mxu1  ;;  %v1922_v56 = vpop.f32.mrb[21].mxu0 }
 0x8f8   :  { %v1462_v57 = vpop.f32.mrb[26].mxu1  ;;  %v1517_v58 = vpop.f32.mrb[22].mxu0 }
 0x8f9   :  { %v1527_v59 = vadd.f32 %v1713_v53, %v1515_v54  ;;  %v1915_v60 = vpop.f32.mrb[27].mxu1  ;;  %v1923_v61 = vpop.f32.mrb[23].mxu0 }
 0x8fb   :  { %v1528_v43 = vmax.f32 %v1527_v59, 0.0 }
 0x8fd   :  { %1927 = vmatmul.mubr.msk.f32.vlgmr.msra.gmra.mrb[28].mxu1 %vm310_vm2, %v1528_v43 }
 0x9d0   :  { %v1601_v0 = vpop.f32.mrb[28].mxu1 }
 0x9d1   :  { %1606 = vst.msk [vmem:[%s1659_s5] sm:$0x3f] %vm1605_vm9, %v1601_v0  ;;  %v1928_v62 = vpop.f32.mrb[29].mxu1 }

</bundles_post_ra>
